<compile_context>
chip_gen: v5e
topology: v5e:2x2
jax: 0.10.0
libtpu: 0.0.40
codegen_flags: <defaults>
</compile_context>

<pallas_src>
import jax
import jax.numpy as jnp
import numpy as np
from jax import lax
from jax.experimental import pallas as pl
from jax.experimental.pallas import tpu as pltpu

# name -> (kernel (kh,kw), padding (ph,pw), dilation)
DW_CONVS = {
    "conv0":   ((5, 5), (2, 2), 1),
    "conv0_1": ((1, 7), (0, 3), 1),
    "conv0_2": ((7, 1), (3, 0), 1),
    "conv1_1": ((1, 3), (0, 2), 1),
    "conv1_2": ((3, 1), (2, 0), 1),
    "conv1_3": ((1, 5), (0, 3), 2),
    "conv1_4": ((5, 1), (3, 0), 2),
    "conv2_1": ((1, 5), (0, 5), 1),
    "conv2_2": ((5, 1), (5, 0), 1),
    "conv2_3": ((1, 5), (0, 5), 4),
    "conv2_4": ((5, 1), (5, 0), 4),
}
DW_ORDER = list(DW_CONVS.keys())


# ---------------------------------------------------------------------------
# Kernel
# ---------------------------------------------------------------------------
def msca5_kernel(x_ref, rcat_ref, amat_ref, bmat_ref, e_ref, w3_ref, b3_ref,
                 o_ref):
    x = x_ref[0].astype(jnp.float32)                      # (C, H, W)
    C, H, W = x.shape

    # ---- conv0 (5x5 depthwise), linear part, as one batched MXU matmul -----
    # xcat[:, h, i*W + m] = x[:, h + i - 2, m]  (zero outside)
    zpad = jnp.zeros((C, 2, W), jnp.float32)
    xpad = jnp.concatenate([zpad, x, zpad], axis=1)       # (C, H+4, W)
    xcat = jnp.concatenate([xpad[:, i:i + H, :] for i in range(5)],
                           axis=2)                        # (C, H, 5W)
    attn = jnp.einsum("chv,cvw->chw", xcat, rcat_ref[...],
                      preferred_element_type=jnp.float32)  # (C, H, W)

    # ---- multi-scale branches: composed per-channel banded operators -------
    # acc = attn + E + sum_b  A_b[c] @ attn[c] @ B_b[c]^T   (E holds all biases)
    acc = attn + e_ref[...]
    for br in range(3):
        t = jnp.einsum("chw,cvw->chv", attn, bmat_ref[br],
                       preferred_element_type=jnp.float32)     # attn @ B^T
        acc = acc + jnp.einsum("cgh,chv->cgv", amat_ref[br], t,
                               preferred_element_type=jnp.float32)  # A @ (.)

    # ---- conv3 (1x1 channel mix, scalar weights from SMEM) + gating --------
    # NOTE: for large C this should become a (C, H*W) MXU matmul; at C=4 the
    # scalar-weighted sum is cheaper than the relayouts it would require.
    outs = []
    for o in range(C):
        m = acc[0] * w3_ref[o, 0]
        for c in range(1, C):
            m = m + acc[c] * w3_ref[o, c]
        outs.append((m + b3_ref[o]) * x[o])
    o_ref[0] = jnp.stack(outs, axis=0).astype(o_ref.dtype)


# ---------------------------------------------------------------------------
# Wrapper
# ---------------------------------------------------------------------------
def msca_attention5(x, packed):
    B, C, H, W = x.shape
    smem = pltpu.MemorySpace.SMEM
    return pl.pallas_call(
        msca5_kernel,
        out_shape=jax.ShapeDtypeStruct((B, C, H, W), x.dtype),
        grid=(B,),
        in_specs=[
            pl.BlockSpec((1, C, H, W), lambda b: (b, 0, 0, 0)),   # x
            pl.BlockSpec((C, 5 * W, W), lambda b: (0, 0, 0)),     # conv0 Toeplitz
            pl.BlockSpec((3, C, H, H), lambda b: (0, 0, 0, 0)),   # branch A mats
            pl.BlockSpec((3, C, W, W), lambda b: (0, 0, 0, 0)),   # branch B mats
            pl.BlockSpec((C, H, W), lambda b: (0, 0, 0)),         # bias field E
            pl.BlockSpec(memory_space=smem),                      # w3 (C, C)
            pl.BlockSpec(memory_space=smem),                      # b3 (C,)
        ],
        out_specs=pl.BlockSpec((1, C, H, W), lambda b: (b, 0, 0, 0)),
        compiler_params=pltpu.CompilerParams(
            dimension_semantics=("parallel",)),
    )(x, packed["rcat"], packed["a_all"], packed["b_all"], packed["e"],
      packed["w3"], packed["b3"])


# ---------------------------------------------------------------------------
# Parameter packing (parameter-only precomputation, independent of x)
# ---------------------------------------------------------------------------
def _toeplitz(vec, n_in, pad, dil):
    """Banded matrix T (n_out, n_in) of a zero-padded 1-D cross-correlation:
       y[n] = sum_k vec[k] * x[n + k*dil - pad]."""
    k = int(vec.shape[0])
    n_out = n_in + 2 * pad - dil * (k - 1)
    T = np.zeros((n_out, n_in), np.float32)
    for n in range(n_out):
        for kk in range(k):
            m = n + kk * dil - pad
            if 0 <= m < n_in:
                T[n, m] = vec[kk]
    return T


def pack_params(params, H, W):
    w0 = np.asarray(params["conv0"][0])          # (C, 1, 5, 5)
    C = w0.shape[0]

    # conv0: stacked, transposed row-Toeplitz blocks  (C, 5W, W)
    rcat = np.zeros((C, 5 * W, W), np.float32)
    for c in range(C):
        for i in range(5):
            R = _toeplitz(w0[c, 0, i, :], W, 2, 1)        # (W_out, W_in)
            rcat[c, i * W:(i + 1) * W, :] = R.T

    def wvec(name, c):   # 1 x k kernels (W direction)
        return np.asarray(params[name][0])[c, 0, 0, :]

    def hvec(name, c):   # k x 1 kernels (H direction)
        return np.asarray(params[name][0])[c, 0, :, 0]

    a_all = np.zeros((3, C, H, H), np.float32)
    b_all = np.zeros((3, C, W, W), np.float32)
    for c in range(C):
        # branch 0: conv0_1 (1x7,p3) -> conv0_2 (7x1,p3)
        b_all[0, c] = _toeplitz(wvec("conv0_1", c), W, 3, 1)
        a_all[0, c] = _toeplitz(hvec("conv0_2", c), H, 3, 1)
        # branch 1: 1x3,p2 -> 3x1,p2 -> 1x5,p3,d2 -> 5x1,p3,d2
        t11 = _toeplitz(wvec("conv1_1", c), W, 2, 1)          # (W+2, W)
        s12 = _toeplitz(hvec("conv1_2", c), H, 2, 1)          # (H+2, H)
        t13 = _toeplitz(wvec("conv1_3", c), W + 2, 3, 2)      # (W, W+2)
        s14 = _toeplitz(hvec("conv1_4", c), H + 2, 3, 2)      # (H, H+2)
        b_all[1, c] = t13 @ t11
        a_all[1, c] = s14 @ s12
        # branch 2: 1x5,p5 -> 5x1,p5 -> 1x5,p5,d4 -> 5x1,p5,d4
        t21 = _toeplitz(wvec("conv2_1", c), W, 5, 1)          # (W+6, W)
        s22 = _toeplitz(hvec("conv2_2", c), H, 5, 1)          # (H+6, H)
        t23 = _toeplitz(wvec("conv2_3", c), W + 6, 5, 4)      # (W, W+6)
        s24 = _toeplitz(hvec("conv2_4", c), H + 6, 5, 4)      # (H, H+6)
        b_all[2, c] = t23 @ t21
        a_all[2, c] = s24 @ s22

    # Affine offset: E = (attn + attn_0 + attn_1 + attn_2) evaluated at x = 0.
    # Captures every depthwise bias propagated through the (exact, affine)
    # branch compositions.  Parameter-only; computed once.
    e_map = np.asarray(
        ref_pre_conv3(jnp.zeros((1, C, H, W), jnp.float32), params))[0]

    w3 = np.asarray(params["conv3"][0]).reshape(C, C).astype(np.float32)
    b3 = np.asarray(params["conv3"][1]).reshape(C).astype(np.float32)

    return dict(rcat=jnp.asarray(rcat), a_all=jnp.asarray(a_all),
                b_all=jnp.asarray(b_all), e=jnp.asarray(e_map),
                w3=jnp.asarray(w3), b3=jnp.asarray(b3))


# ---------------------------------------------------------------------------
# Pure-JAX reference (faithful to the torch module) for the correctness check
# ---------------------------------------------------------------------------
def ref_dw(x, name, params):
    (ph, pw), d = DW_CONVS[name][1], DW_CONVS[name][2]
    w, b = params[name]
    C = x.shape[1]
    y = lax.conv_general_dilated(
        x, w, (1, 1), ((ph, ph), (pw, pw)),
        rhs_dilation=(d, d),
        dimension_numbers=("NCHW", "OIHW", "NCHW"),
        feature_group_count=C)
    return y + b.reshape(1, -1, 1, 1)


def ref_pre_conv3(x, params):
    attn = ref_dw(x, "conv0", params)
    a0 = ref_dw(ref_dw(attn, "conv0_1", params), "conv0_2", params)
    a1 = attn
    for n in ("conv1_1", "conv1_2", "conv1_3", "conv1_4"):
        a1 = ref_dw(a1, n, params)
    a2 = attn
    for n in ("conv2_1", "conv2_2", "conv2_3", "conv2_4"):
        a2 = ref_dw(a2, n, params)
    return attn + a0 + a1 + a2


def ref_forward(x, params):
    pre = ref_pre_conv3(x, params)
    w3, b3 = params["conv3"]
    mixed = lax.conv_general_dilated(
        pre, w3, (1, 1), ((0, 0), (0, 0)),
        dimension_numbers=("NCHW", "OIHW", "NCHW")) + b3.reshape(1, -1, 1, 1)
    return mixed * x


# ---------------------------------------------------------------------------
# Deterministic synthetic parameters
# ---------------------------------------------------------------------------
def init_params(key, C):
    params = {}
    keys = jax.random.split(key, 2 * (len(DW_ORDER) + 1))
    i = 0
    for name in DW_ORDER:
        kh, kw = DW_CONVS[name][0]
        w = 0.2 * jax.random.normal(keys[i], (C, 1, kh, kw), jnp.float32); i += 1
        b = 0.1 * jax.random.normal(keys[i], (C,), jnp.float32); i += 1
        params[name] = (w, b)
    w3 = 0.2 * jax.random.normal(keys[i], (C, C, 1, 1), jnp.float32); i += 1
    b3 = 0.1 * jax.random.normal(keys[i], (C,), jnp.float32)
    params["conv3"] = (w3, b3)
    return params


if __name__ == "__main__":
    B, C, H, W = 2, 4, 16, 16
    key = jax.random.PRNGKey(0)
    kx, kp = jax.random.split(key)
    x = jax.random.normal(kx, (B, C, H, W), jnp.float32)
    params = init_params(kp, C)
    packed = pack_params(params, H, W)

    out = msca_attention5(x, packed)
    out = jax.block_until_ready(out)

    ref = ref_forward(x, params)
    # Tolerance leaves headroom for the MXU's multi-pass f32 emulation while
    # still catching any structural / boundary / dilation error (those show up
    # as O(0.1) deviations).
    np.testing.assert_allclose(np.asarray(out), np.asarray(ref),
                               rtol=2e-2, atol=2e-2)
    print("KERNEL_OK")
</pallas_src>

<mosaic_0001>
module attributes {stable_mosaic.version = 11 : i64} {
  func.func @msca5_kernel(%arg0: i32, %arg1: memref<1x4x16x16xf32, #tpu.memory_space<vmem>>, %arg2: memref<4x80x16xf32, #tpu.memory_space<vmem>>, %arg3: memref<3x4x16x16xf32, #tpu.memory_space<vmem>>, %arg4: memref<3x4x16x16xf32, #tpu.memory_space<vmem>>, %arg5: memref<4x16x16xf32, #tpu.memory_space<vmem>>, %arg6: memref<4x4xf32, #tpu.memory_space<smem>>, %arg7: memref<4xf32, #tpu.memory_space<smem>>, %arg8: memref<1x4x16x16xf32, #tpu.memory_space<vmem>>) attributes {dimension_semantics = [#tpu.dimension_semantics<parallel>], iteration_bounds = array<i64: 2>, scalar_prefetch = 0 : i64, scratch_operands = 0 : i64, tpu.core_type = #tpu.core_type<tc>, window_params = [{transform_indices = @transform_0, window_bounds = array<i64: 1, 4, 16, 16>}, {pipeline_mode = #tpu.pipeline_mode<synchronous>, transform_indices = @transform_1, window_bounds = array<i64: 4, 80, 16>}, {pipeline_mode = #tpu.pipeline_mode<synchronous>, transform_indices = @transform_2, window_bounds = array<i64: 3, 4, 16, 16>}, {pipeline_mode = #tpu.pipeline_mode<synchronous>, transform_indices = @transform_3, window_bounds = array<i64: 3, 4, 16, 16>}, {pipeline_mode = #tpu.pipeline_mode<synchronous>, transform_indices = @transform_4, window_bounds = array<i64: 4, 16, 16>}, {transform_indices = @transform_5, window_bounds = array<i64: 4, 4>}, {transform_indices = @transform_6, window_bounds = array<i64: 4>}, {transform_indices = @transform_7, window_bounds = array<i64: 1, 4, 16, 16>}]} {
    %c0 = arith.constant 0 : index
    %c0_0 = arith.constant 0 : index
    %c0_1 = arith.constant 0 : index
    %c0_2 = arith.constant 0 : index
    %0 = vector.load %arg1[%c0, %c0_0, %c0_1, %c0_2] : memref<1x4x16x16xf32, #tpu.memory_space<vmem>>, vector<1x4x16x16xf32>
    %1 = vector.shape_cast %0 : vector<1x4x16x16xf32> to vector<4x16x16xf32>
    %cst = arith.constant 0.000000e+00 : f32
    %2 = vector.broadcast %cst : f32 to vector<4x2x16xf32>
    %3 = tpu.concatenate %2, %1, %2 in 1 : vector<4x2x16xf32>, vector<4x16x16xf32>, vector<4x2x16xf32> -> vector<4x20x16xf32>
    %4 = vector.extract_strided_slice %3 {offsets = [0, 0, 0], sizes = [4, 16, 16], strides = [1, 1, 1]} : vector<4x20x16xf32> to vector<4x16x16xf32>
    %5 = vector.extract_strided_slice %3 {offsets = [0, 1, 0], sizes = [4, 16, 16], strides = [1, 1, 1]} : vector<4x20x16xf32> to vector<4x16x16xf32>
    %6 = vector.extract_strided_slice %3 {offsets = [0, 2, 0], sizes = [4, 16, 16], strides = [1, 1, 1]} : vector<4x20x16xf32> to vector<4x16x16xf32>
    %7 = vector.extract_strided_slice %3 {offsets = [0, 3, 0], sizes = [4, 16, 16], strides = [1, 1, 1]} : vector<4x20x16xf32> to vector<4x16x16xf32>
    %8 = vector.extract_strided_slice %3 {offsets = [0, 4, 0], sizes = [4, 16, 16], strides = [1, 1, 1]} : vector<4x20x16xf32> to vector<4x16x16xf32>
    %9 = tpu.concatenate %4, %5, %6, %7, %8 in 2 : vector<4x16x16xf32>, vector<4x16x16xf32>, vector<4x16x16xf32>, vector<4x16x16xf32>, vector<4x16x16xf32> -> vector<4x16x80xf32>
    %c0_3 = arith.constant 0 : index
    %c0_4 = arith.constant 0 : index
    %c0_5 = arith.constant 0 : index
    %10 = vector.load %arg2[%c0_3, %c0_4, %c0_5] : memref<4x80x16xf32, #tpu.memory_space<vmem>>, vector<4x80x16xf32>
    "tpu.trace_start"() <{level = 10 : i32, message = "chv,cvw->chw"}> : () -> ()
    %cst_6 = arith.constant dense<0.000000e+00> : vector<4x16x16xf32>
    %11 = tpu.matmul %9, %10, %cst_6 {dimension_numbers = #tpu.dot_dimension_numbers<[2], [1], [1], [2], [0, 0, 0, 1, 1, 2], [0], [0]>} : vector<4x16x80xf32>, vector<4x80x16xf32>, vector<4x16x16xf32> -> vector<4x16x16xf32>
    "tpu.trace_stop"() : () -> ()
    %c0_7 = arith.constant 0 : index
    %c0_8 = arith.constant 0 : index
    %c0_9 = arith.constant 0 : index
    %12 = vector.load %arg5[%c0_7, %c0_8, %c0_9] : memref<4x16x16xf32, #tpu.memory_space<vmem>>, vector<4x16x16xf32>
    %13 = arith.addf %11, %12 : vector<4x16x16xf32>
    %c0_10 = arith.constant 0 : index
    %c0_11 = arith.constant 0 : index
    %c0_12 = arith.constant 0 : index
    %c0_13 = arith.constant 0 : index
    %14 = vector.load %arg4[%c0_10, %c0_11, %c0_12, %c0_13] : memref<3x4x16x16xf32, #tpu.memory_space<vmem>>, vector<1x4x16x16xf32>
    %15 = vector.shape_cast %14 : vector<1x4x16x16xf32> to vector<4x16x16xf32>
    "tpu.trace_start"() <{level = 10 : i32, message = "chw,cvw->chv"}> : () -> ()
    %cst_14 = arith.constant dense<0.000000e+00> : vector<4x16x16xf32>
    %16 = tpu.matmul %11, %15, %cst_14 {dimension_numbers = #tpu.dot_dimension_numbers<[2], [2], [1], [1], [0, 0, 0, 1, 1, 1], [0], [0]>} : vector<4x16x16xf32>, vector<4x16x16xf32>, vector<4x16x16xf32> -> vector<4x16x16xf32>
    "tpu.trace_stop"() : () -> ()
    %c0_15 = arith.constant 0 : index
    %c0_16 = arith.constant 0 : index
    %c0_17 = arith.constant 0 : index
    %c0_18 = arith.constant 0 : index
    %17 = vector.load %arg3[%c0_15, %c0_16, %c0_17, %c0_18] : memref<3x4x16x16xf32, #tpu.memory_space<vmem>>, vector<1x4x16x16xf32>
    %18 = vector.shape_cast %17 : vector<1x4x16x16xf32> to vector<4x16x16xf32>
    "tpu.trace_start"() <{level = 10 : i32, message = "cgh,chv->cgv"}> : () -> ()
    %cst_19 = arith.constant dense<0.000000e+00> : vector<4x16x16xf32>
    %19 = tpu.matmul %18, %16, %cst_19 {dimension_numbers = #tpu.dot_dimension_numbers<[2], [1], [1], [2], [0, 0, 0, 1, 1, 2], [0], [0]>} : vector<4x16x16xf32>, vector<4x16x16xf32>, vector<4x16x16xf32> -> vector<4x16x16xf32>
    "tpu.trace_stop"() : () -> ()
    %20 = arith.addf %13, %19 : vector<4x16x16xf32>
    %c1 = arith.constant 1 : index
    %c0_20 = arith.constant 0 : index
    %c0_21 = arith.constant 0 : index
    %c0_22 = arith.constant 0 : index
    %21 = vector.load %arg4[%c1, %c0_20, %c0_21, %c0_22] : memref<3x4x16x16xf32, #tpu.memory_space<vmem>>, vector<1x4x16x16xf32>
    %22 = vector.shape_cast %21 : vector<1x4x16x16xf32> to vector<4x16x16xf32>
    "tpu.trace_start"() <{level = 10 : i32, message = "chw,cvw->chv"}> : () -> ()
    %cst_23 = arith.constant dense<0.000000e+00> : vector<4x16x16xf32>
    %23 = tpu.matmul %11, %22, %cst_23 {dimension_numbers = #tpu.dot_dimension_numbers<[2], [2], [1], [1], [0, 0, 0, 1, 1, 1], [0], [0]>} : vector<4x16x16xf32>, vector<4x16x16xf32>, vector<4x16x16xf32> -> vector<4x16x16xf32>
    "tpu.trace_stop"() : () -> ()
    %c1_24 = arith.constant 1 : index
    %c0_25 = arith.constant 0 : index
    %c0_26 = arith.constant 0 : index
    %c0_27 = arith.constant 0 : index
    %24 = vector.load %arg3[%c1_24, %c0_25, %c0_26, %c0_27] : memref<3x4x16x16xf32, #tpu.memory_space<vmem>>, vector<1x4x16x16xf32>
    %25 = vector.shape_cast %24 : vector<1x4x16x16xf32> to vector<4x16x16xf32>
    "tpu.trace_start"() <{level = 10 : i32, message = "cgh,chv->cgv"}> : () -> ()
    %cst_28 = arith.constant dense<0.000000e+00> : vector<4x16x16xf32>
    %26 = tpu.matmul %25, %23, %cst_28 {dimension_numbers = #tpu.dot_dimension_numbers<[2], [1], [1], [2], [0, 0, 0, 1, 1, 2], [0], [0]>} : vector<4x16x16xf32>, vector<4x16x16xf32>, vector<4x16x16xf32> -> vector<4x16x16xf32>
    "tpu.trace_stop"() : () -> ()
    %27 = arith.addf %20, %26 : vector<4x16x16xf32>
    %c2 = arith.constant 2 : index
    %c0_29 = arith.constant 0 : index
    %c0_30 = arith.constant 0 : index
    %c0_31 = arith.constant 0 : index
    %28 = vector.load %arg4[%c2, %c0_29, %c0_30, %c0_31] : memref<3x4x16x16xf32, #tpu.memory_space<vmem>>, vector<1x4x16x16xf32>
    %29 = vector.shape_cast %28 : vector<1x4x16x16xf32> to vector<4x16x16xf32>
    "tpu.trace_start"() <{level = 10 : i32, message = "chw,cvw->chv"}> : () -> ()
    %cst_32 = arith.constant dense<0.000000e+00> : vector<4x16x16xf32>
    %30 = tpu.matmul %11, %29, %cst_32 {dimension_numbers = #tpu.dot_dimension_numbers<[2], [2], [1], [1], [0, 0, 0, 1, 1, 1], [0], [0]>} : vector<4x16x16xf32>, vector<4x16x16xf32>, vector<4x16x16xf32> -> vector<4x16x16xf32>
    "tpu.trace_stop"() : () -> ()
    %c2_33 = arith.constant 2 : index
    %c0_34 = arith.constant 0 : index
    %c0_35 = arith.constant 0 : index
    %c0_36 = arith.constant 0 : index
    %31 = vector.load %arg3[%c2_33, %c0_34, %c0_35, %c0_36] : memref<3x4x16x16xf32, #tpu.memory_space<vmem>>, vector<1x4x16x16xf32>
    %32 = vector.shape_cast %31 : vector<1x4x16x16xf32> to vector<4x16x16xf32>
    "tpu.trace_start"() <{level = 10 : i32, message = "cgh,chv->cgv"}> : () -> ()
    %cst_37 = arith.constant dense<0.000000e+00> : vector<4x16x16xf32>
    %33 = tpu.matmul %32, %30, %cst_37 {dimension_numbers = #tpu.dot_dimension_numbers<[2], [1], [1], [2], [0, 0, 0, 1, 1, 2], [0], [0]>} : vector<4x16x16xf32>, vector<4x16x16xf32>, vector<4x16x16xf32> -> vector<4x16x16xf32>
    "tpu.trace_stop"() : () -> ()
    %34 = arith.addf %27, %33 : vector<4x16x16xf32>
    %35 = vector.extract_strided_slice %34 {offsets = [0, 0, 0], sizes = [1, 16, 16], strides = [1, 1, 1]} : vector<4x16x16xf32> to vector<1x16x16xf32>
    %36 = vector.shape_cast %35 : vector<1x16x16xf32> to vector<16x16xf32>
    %c0_38 = arith.constant 0 : index
    %c0_39 = arith.constant 0 : index
    %37 = memref.load %arg6[%c0_38, %c0_39] : memref<4x4xf32, #tpu.memory_space<smem>>
    %38 = vector.broadcast %37 : f32 to vector<16x16xf32>
    %39 = arith.mulf %36, %38 : vector<16x16xf32>
    %40 = vector.extract_strided_slice %34 {offsets = [1, 0, 0], sizes = [1, 16, 16], strides = [1, 1, 1]} : vector<4x16x16xf32> to vector<1x16x16xf32>
    %41 = vector.shape_cast %40 : vector<1x16x16xf32> to vector<16x16xf32>
    %c0_40 = arith.constant 0 : index
    %c1_41 = arith.constant 1 : index
    %42 = memref.load %arg6[%c0_40, %c1_41] : memref<4x4xf32, #tpu.memory_space<smem>>
    %43 = vector.broadcast %42 : f32 to vector<16x16xf32>
    %44 = arith.mulf %41, %43 : vector<16x16xf32>
    %45 = arith.addf %39, %44 : vector<16x16xf32>
    %46 = vector.extract_strided_slice %34 {offsets = [2, 0, 0], sizes = [1, 16, 16], strides = [1, 1, 1]} : vector<4x16x16xf32> to vector<1x16x16xf32>
    %47 = vector.shape_cast %46 : vector<1x16x16xf32> to vector<16x16xf32>
    %c0_42 = arith.constant 0 : index
    %c2_43 = arith.constant 2 : index
    %48 = memref.load %arg6[%c0_42, %c2_43] : memref<4x4xf32, #tpu.memory_space<smem>>
    %49 = vector.broadcast %48 : f32 to vector<16x16xf32>
    %50 = arith.mulf %47, %49 : vector<16x16xf32>
    %51 = arith.addf %45, %50 : vector<16x16xf32>
    %52 = vector.extract_strided_slice %34 {offsets = [3, 0, 0], sizes = [1, 16, 16], strides = [1, 1, 1]} : vector<4x16x16xf32> to vector<1x16x16xf32>
    %53 = vector.shape_cast %52 : vector<1x16x16xf32> to vector<16x16xf32>
    %c0_44 = arith.constant 0 : index
    %c3 = arith.constant 3 : index
    %54 = memref.load %arg6[%c0_44, %c3] : memref<4x4xf32, #tpu.memory_space<smem>>
    %55 = vector.broadcast %54 : f32 to vector<16x16xf32>
    %56 = arith.mulf %53, %55 : vector<16x16xf32>
    %57 = arith.addf %51, %56 : vector<16x16xf32>
    %c0_45 = arith.constant 0 : index
    %58 = memref.load %arg7[%c0_45] : memref<4xf32, #tpu.memory_space<smem>>
    %59 = vector.broadcast %58 : f32 to vector<16x16xf32>
    %60 = arith.addf %57, %59 : vector<16x16xf32>
    %61 = vector.extract_strided_slice %1 {offsets = [0, 0, 0], sizes = [1, 16, 16], strides = [1, 1, 1]} : vector<4x16x16xf32> to vector<1x16x16xf32>
    %62 = vector.shape_cast %61 : vector<1x16x16xf32> to vector<16x16xf32>
    %63 = arith.mulf %60, %62 : vector<16x16xf32>
    %64 = vector.extract_strided_slice %34 {offsets = [0, 0, 0], sizes = [1, 16, 16], strides = [1, 1, 1]} : vector<4x16x16xf32> to vector<1x16x16xf32>
    %65 = vector.shape_cast %64 : vector<1x16x16xf32> to vector<16x16xf32>
    %c1_46 = arith.constant 1 : index
    %c0_47 = arith.constant 0 : index
    %66 = memref.load %arg6[%c1_46, %c0_47] : memref<4x4xf32, #tpu.memory_space<smem>>
    %67 = vector.broadcast %66 : f32 to vector<16x16xf32>
    %68 = arith.mulf %65, %67 : vector<16x16xf32>
    %69 = vector.extract_strided_slice %34 {offsets = [1, 0, 0], sizes = [1, 16, 16], strides = [1, 1, 1]} : vector<4x16x16xf32> to vector<1x16x16xf32>
    %70 = vector.shape_cast %69 : vector<1x16x16xf32> to vector<16x16xf32>
    %c1_48 = arith.constant 1 : index
    %c1_49 = arith.constant 1 : index
    %71 = memref.load %arg6[%c1_48, %c1_49] : memref<4x4xf32, #tpu.memory_space<smem>>
    %72 = vector.broadcast %71 : f32 to vector<16x16xf32>
    %73 = arith.mulf %70, %72 : vector<16x16xf32>
    %74 = arith.addf %68, %73 : vector<16x16xf32>
    %75 = vector.extract_strided_slice %34 {offsets = [2, 0, 0], sizes = [1, 16, 16], strides = [1, 1, 1]} : vector<4x16x16xf32> to vector<1x16x16xf32>
    %76 = vector.shape_cast %75 : vector<1x16x16xf32> to vector<16x16xf32>
    %c1_50 = arith.constant 1 : index
    %c2_51 = arith.constant 2 : index
    %77 = memref.load %arg6[%c1_50, %c2_51] : memref<4x4xf32, #tpu.memory_space<smem>>
    %78 = vector.broadcast %77 : f32 to vector<16x16xf32>
    %79 = arith.mulf %76, %78 : vector<16x16xf32>
    %80 = arith.addf %74, %79 : vector<16x16xf32>
    %81 = vector.extract_strided_slice %34 {offsets = [3, 0, 0], sizes = [1, 16, 16], strides = [1, 1, 1]} : vector<4x16x16xf32> to vector<1x16x16xf32>
    %82 = vector.shape_cast %81 : vector<1x16x16xf32> to vector<16x16xf32>
    %c1_52 = arith.constant 1 : index
    %c3_53 = arith.constant 3 : index
    %83 = memref.load %arg6[%c1_52, %c3_53] : memref<4x4xf32, #tpu.memory_space<smem>>
    %84 = vector.broadcast %83 : f32 to vector<16x16xf32>
    %85 = arith.mulf %82, %84 : vector<16x16xf32>
    %86 = arith.addf %80, %85 : vector<16x16xf32>
    %c1_54 = arith.constant 1 : index
    %87 = memref.load %arg7[%c1_54] : memref<4xf32, #tpu.memory_space<smem>>
    %88 = vector.broadcast %87 : f32 to vector<16x16xf32>
    %89 = arith.addf %86, %88 : vector<16x16xf32>
    %90 = vector.extract_strided_slice %1 {offsets = [1, 0, 0], sizes = [1, 16, 16], strides = [1, 1, 1]} : vector<4x16x16xf32> to vector<1x16x16xf32>
    %91 = vector.shape_cast %90 : vector<1x16x16xf32> to vector<16x16xf32>
    %92 = arith.mulf %89, %91 : vector<16x16xf32>
    %93 = vector.extract_strided_slice %34 {offsets = [0, 0, 0], sizes = [1, 16, 16], strides = [1, 1, 1]} : vector<4x16x16xf32> to vector<1x16x16xf32>
    %94 = vector.shape_cast %93 : vector<1x16x16xf32> to vector<16x16xf32>
    %c2_55 = arith.constant 2 : index
    %c0_56 = arith.constant 0 : index
    %95 = memref.load %arg6[%c2_55, %c0_56] : memref<4x4xf32, #tpu.memory_space<smem>>
    %96 = vector.broadcast %95 : f32 to vector<16x16xf32>
    %97 = arith.mulf %94, %96 : vector<16x16xf32>
    %98 = vector.extract_strided_slice %34 {offsets = [1, 0, 0], sizes = [1, 16, 16], strides = [1, 1, 1]} : vector<4x16x16xf32> to vector<1x16x16xf32>
    %99 = vector.shape_cast %98 : vector<1x16x16xf32> to vector<16x16xf32>
    %c2_57 = arith.constant 2 : index
    %c1_58 = arith.constant 1 : index
    %100 = memref.load %arg6[%c2_57, %c1_58] : memref<4x4xf32, #tpu.memory_space<smem>>
    %101 = vector.broadcast %100 : f32 to vector<16x16xf32>
    %102 = arith.mulf %99, %101 : vector<16x16xf32>
    %103 = arith.addf %97, %102 : vector<16x16xf32>
    %104 = vector.extract_strided_slice %34 {offsets = [2, 0, 0], sizes = [1, 16, 16], strides = [1, 1, 1]} : vector<4x16x16xf32> to vector<1x16x16xf32>
    %105 = vector.shape_cast %104 : vector<1x16x16xf32> to vector<16x16xf32>
    %c2_59 = arith.constant 2 : index
    %c2_60 = arith.constant 2 : index
    %106 = memref.load %arg6[%c2_59, %c2_60] : memref<4x4xf32, #tpu.memory_space<smem>>
    %107 = vector.broadcast %106 : f32 to vector<16x16xf32>
    %108 = arith.mulf %105, %107 : vector<16x16xf32>
    %109 = arith.addf %103, %108 : vector<16x16xf32>
    %110 = vector.extract_strided_slice %34 {offsets = [3, 0, 0], sizes = [1, 16, 16], strides = [1, 1, 1]} : vector<4x16x16xf32> to vector<1x16x16xf32>
    %111 = vector.shape_cast %110 : vector<1x16x16xf32> to vector<16x16xf32>
    %c2_61 = arith.constant 2 : index
    %c3_62 = arith.constant 3 : index
    %112 = memref.load %arg6[%c2_61, %c3_62] : memref<4x4xf32, #tpu.memory_space<smem>>
    %113 = vector.broadcast %112 : f32 to vector<16x16xf32>
    %114 = arith.mulf %111, %113 : vector<16x16xf32>
    %115 = arith.addf %109, %114 : vector<16x16xf32>
    %c2_63 = arith.constant 2 : index
    %116 = memref.load %arg7[%c2_63] : memref<4xf32, #tpu.memory_space<smem>>
    %117 = vector.broadcast %116 : f32 to vector<16x16xf32>
    %118 = arith.addf %115, %117 : vector<16x16xf32>
    %119 = vector.extract_strided_slice %1 {offsets = [2, 0, 0], sizes = [1, 16, 16], strides = [1, 1, 1]} : vector<4x16x16xf32> to vector<1x16x16xf32>
    %120 = vector.shape_cast %119 : vector<1x16x16xf32> to vector<16x16xf32>
    %121 = arith.mulf %118, %120 : vector<16x16xf32>
    %122 = vector.extract_strided_slice %34 {offsets = [0, 0, 0], sizes = [1, 16, 16], strides = [1, 1, 1]} : vector<4x16x16xf32> to vector<1x16x16xf32>
    %123 = vector.shape_cast %122 : vector<1x16x16xf32> to vector<16x16xf32>
    %c3_64 = arith.constant 3 : index
    %c0_65 = arith.constant 0 : index
    %124 = memref.load %arg6[%c3_64, %c0_65] : memref<4x4xf32, #tpu.memory_space<smem>>
    %125 = vector.broadcast %124 : f32 to vector<16x16xf32>
    %126 = arith.mulf %123, %125 : vector<16x16xf32>
    %127 = vector.extract_strided_slice %34 {offsets = [1, 0, 0], sizes = [1, 16, 16], strides = [1, 1, 1]} : vector<4x16x16xf32> to vector<1x16x16xf32>
    %128 = vector.shape_cast %127 : vector<1x16x16xf32> to vector<16x16xf32>
    %c3_66 = arith.constant 3 : index
    %c1_67 = arith.constant 1 : index
    %129 = memref.load %arg6[%c3_66, %c1_67] : memref<4x4xf32, #tpu.memory_space<smem>>
    %130 = vector.broadcast %129 : f32 to vector<16x16xf32>
    %131 = arith.mulf %128, %130 : vector<16x16xf32>
    %132 = arith.addf %126, %131 : vector<16x16xf32>
    %133 = vector.extract_strided_slice %34 {offsets = [2, 0, 0], sizes = [1, 16, 16], strides = [1, 1, 1]} : vector<4x16x16xf32> to vector<1x16x16xf32>
    %134 = vector.shape_cast %133 : vector<1x16x16xf32> to vector<16x16xf32>
    %c3_68 = arith.constant 3 : index
    %c2_69 = arith.constant 2 : index
    %135 = memref.load %arg6[%c3_68, %c2_69] : memref<4x4xf32, #tpu.memory_space<smem>>
    %136 = vector.broadcast %135 : f32 to vector<16x16xf32>
    %137 = arith.mulf %134, %136 : vector<16x16xf32>
    %138 = arith.addf %132, %137 : vector<16x16xf32>
    %139 = vector.extract_strided_slice %34 {offsets = [3, 0, 0], sizes = [1, 16, 16], strides = [1, 1, 1]} : vector<4x16x16xf32> to vector<1x16x16xf32>
    %140 = vector.shape_cast %139 : vector<1x16x16xf32> to vector<16x16xf32>
    %c3_70 = arith.constant 3 : index
    %c3_71 = arith.constant 3 : index
    %141 = memref.load %arg6[%c3_70, %c3_71] : memref<4x4xf32, #tpu.memory_space<smem>>
    %142 = vector.broadcast %141 : f32 to vector<16x16xf32>
    %143 = arith.mulf %140, %142 : vector<16x16xf32>
    %144 = arith.addf %138, %143 : vector<16x16xf32>
    %c3_72 = arith.constant 3 : index
    %145 = memref.load %arg7[%c3_72] : memref<4xf32, #tpu.memory_space<smem>>
    %146 = vector.broadcast %145 : f32 to vector<16x16xf32>
    %147 = arith.addf %144, %146 : vector<16x16xf32>
    %148 = vector.extract_strided_slice %1 {offsets = [3, 0, 0], sizes = [1, 16, 16], strides = [1, 1, 1]} : vector<4x16x16xf32> to vector<1x16x16xf32>
    %149 = vector.shape_cast %148 : vector<1x16x16xf32> to vector<16x16xf32>
    %150 = arith.mulf %147, %149 : vector<16x16xf32>
    %151 = vector.shape_cast %63 : vector<16x16xf32> to vector<1x16x16xf32>
    %152 = vector.shape_cast %92 : vector<16x16xf32> to vector<1x16x16xf32>
    %153 = vector.shape_cast %121 : vector<16x16xf32> to vector<1x16x16xf32>
    %154 = vector.shape_cast %150 : vector<16x16xf32> to vector<1x16x16xf32>
    %155 = tpu.concatenate %151, %152, %153, %154 in 0 : vector<1x16x16xf32>, vector<1x16x16xf32>, vector<1x16x16xf32>, vector<1x16x16xf32> -> vector<4x16x16xf32>
    %c0_73 = arith.constant 0 : index
    %c0_74 = arith.constant 0 : index
    %c0_75 = arith.constant 0 : index
    %c0_76 = arith.constant 0 : index
    %156 = vector.load %arg8[%c0_73, %c0_74, %c0_75, %c0_76] : memref<1x4x16x16xf32, #tpu.memory_space<vmem>>, vector<1x4x16x16xf32>
    %157 = vector.shape_cast %156 : vector<1x4x16x16xf32> to vector<4x16x16xf32>
    %158 = vector.shape_cast %155 : vector<4x16x16xf32> to vector<1x4x16x16xf32>
    tpu.vector_store %arg8[%c0_73, %c0_74, %c0_75, %c0_76], %158 {strides = array<i32>} : memref<1x4x16x16xf32, #tpu.memory_space<vmem>>, vector<1x4x16x16xf32>,
    return
  }
  func.func @transform_0(%arg0: i32) -> (i32, i32, i32, i32) {
    %c0_i32 = arith.constant 0 : i32
    %c0_i32_0 = arith.constant 0 : i32
    %c0_i32_1 = arith.constant 0 : i32
    %c0_i32_2 = arith.constant 0 : i32
    return %arg0, %c0_i32, %c0_i32_0, %c0_i32_1 : i32, i32, i32, i32
  }
  func.func @transform_1(%arg0: i32) -> (i32, i32, i32) {
    %c0_i32 = arith.constant 0 : i32
    %c0_i32_0 = arith.constant 0 : i32
    %c0_i32_1 = arith.constant 0 : i32
    %c0_i32_2 = arith.constant 0 : i32
    return %c0_i32, %c0_i32_0, %c0_i32_1 : i32, i32, i32
  }
  func.func @transform_2(%arg0: i32) -> (i32, i32, i32, i32) {
    %c0_i32 = arith.constant 0 : i32
    %c0_i32_0 = arith.constant 0 : i32
    %c0_i32_1 = arith.constant 0 : i32
    %c0_i32_2 = arith.constant 0 : i32
    %c0_i32_3 = arith.constant 0 : i32
    return %c0_i32, %c0_i32_0, %c0_i32_1, %c0_i32_2 : i32, i32, i32, i32
  }
  func.func @transform_3(%arg0: i32) -> (i32, i32, i32, i32) {
    %c0_i32 = arith.constant 0 : i32
    %c0_i32_0 = arith.constant 0 : i32
    %c0_i32_1 = arith.constant 0 : i32
    %c0_i32_2 = arith.constant 0 : i32
    %c0_i32_3 = arith.constant 0 : i32
    return %c0_i32, %c0_i32_0, %c0_i32_1, %c0_i32_2 : i32, i32, i32, i32
  }
  func.func @transform_4(%arg0: i32) -> (i32, i32, i32) {
    %c0_i32 = arith.constant 0 : i32
    %c0_i32_0 = arith.constant 0 : i32
    %c0_i32_1 = arith.constant 0 : i32
    %c0_i32_2 = arith.constant 0 : i32
    return %c0_i32, %c0_i32_0, %c0_i32_1 : i32, i32, i32
  }
  func.func @transform_5(%arg0: i32) -> (i32, i32) {
    %c0_i32 = arith.constant 0 : i32
    %c0_i32_0 = arith.constant 0 : i32
    %c0_i32_1 = arith.constant 0 : i32
    return %c0_i32, %c0_i32_0 : i32, i32
  }
  func.func @transform_6(%arg0: i32) -> i32 {
    %c0_i32 = arith.constant 0 : i32
    %c0_i32_0 = arith.constant 0 : i32
    return %c0_i32 : i32
  }
  func.func @transform_7(%arg0: i32) -> (i32, i32, i32, i32) {
    %c0_i32 = arith.constant 0 : i32
    %c0_i32_0 = arith.constant 0 : i32
    %c0_i32_1 = arith.constant 0 : i32
    %c0_i32_2 = arith.constant 0 : i32
    return %arg0, %c0_i32, %c0_i32_0, %c0_i32_1 : i32, i32, i32, i32
  }
}

</mosaic_0001>

<bundles_post_ra>
// kernel: tpu_custom_call.1
= control target key start
LH: loop header
LB: loop body
LE: loop exit
PB: predicated region body
PF: predicated region fallthrough
CT: control target
= control target key end

     0   :  { %s3192_s0 = inlined_call_operand.hbm [shape: f32[2,4,16,16], index: 0, kind: input, shape index: {}]   ;;  %s3193_s1 = inlined_call_operand.vmem [shape: f32[4,80,16], index: 1, kind: input, shape index: {}]   ;;  %s3194_s2 = inlined_call_operand.vmem [shape: f32[3,4,16,16], index: 2, kind: input, shape index: {}]   ;;  %s3195_s3 = inlined_call_operand.vmem [shape: f32[3,4,16,16], index: 3, kind: input, shape index: {}]   ;;  %s3196_s4 = inlined_call_operand.hbm [shape: f32[4,16,16], index: 4, kind: input, shape index: {}]   ;;  %s3197_s5 = inlined_call_operand.vmem [shape: f32[4,4], index: 5, kind: input, shape index: {}]   ;;  %s3198_s6 = inlined_call_operand.hbm [shape: f32[4], index: 6, kind: input, shape index: {}]   ;;  %s3199_s7 = inlined_call_operand.hbm [shape: f32[2,4,16,16], index: 7, kind: output, shape index: {}]  }
   0x1   :  { %3203 = sst [smem:[#allocation18_spill]] %s3192_s0 }
   0x2   :  { %3204 = sst [smem:[#allocation19_spill]] %s3193_s1 }
   0x3   :  { %3205 = sst [smem:[#allocation20_spill]] %s3194_s2 }
   0x4   :  { %3206 = sst [smem:[#allocation21_spill]] %s3195_s3 }
   0x5   :  { %3207 = sst [smem:[#allocation22_spill]] %s3196_s4 }
   0x6   :  { %3208 = sst [smem:[#allocation23_spill]] %s3197_s5 }
   0x7   :  { %3209 = sst [smem:[#allocation24_spill]] %s3198_s6 }
   0x8   :  { %12 = vsyncpa [#allocation3], 0 }
   0x9   :  { %14 = vsyncpa [#allocation3 + $0x1], 0 }
   0xa   :  { %15 = vsyncpa [#allocation8], 0 }
   0xb   :  { %16 = vsyncpa [#allocation6], 0 }
   0xc   :  { %17 = vsyncpa [#allocation5], 0 }
   0xd   :  { %18 = vsyncpa [#allocation4], 0 }
   0xe   :  { %20 = vsyncpa [#allocation4 + $0x1], 0  ;;  %s2294_s24 = smov 0   ;;  %s2296_s25 = smov 0  }
   0xf   :  { %s2298_s26 = smov 0   ;;  %s2300_s27 = smov 0  }
  0x10 LB: > { %s2315_s28 = sadd.s32 4294967295, %s2241_s27   ;;  %s1828_s29 = sadd.s32 4294967294, %s2241_s27   ;;  %s2241_s27 = sphi %s2300_s27, %s3231_s27   ;;  %s2237_s26 = sphi %s2298_s26, %s3230_s26   ;;  %s2233_s25 = sphi %s2296_s25, %s3229_s25   ;;  %s2229_s24 = sphi %s2294_s24, %s3228_s24  }
  0x11   : > { %p46_p0 = scmp.ne.s32.totalorder %s2233_s25, %s2229_s24  ;;  %p47_p1 = scmp.eq.s32.totalorder %s2315_s28, 0 }
  0x12   : > { %p196_p2 = scmp.eq.s32.totalorder %s2315_s28, 1  ;;  %p202_p3 = scmp.eq.s32.totalorder %s1828_s29, 1 }
  0x13   : > { %p2324_p4 = por %p47_p1, %p46_p0  ;;  %p1829_p5 = scmp.ge.s32.totalorder %s2241_s27, 1 }
  0x14   : > { %p2329_p6 = por %p202_p3, %p46_p0  ;;  %p209_p7 = scmp.lt.s32.totalorder %s2241_s27, 3 }
  0x15   : > { %s3212_s4 = sld [smem:[#allocation22_spill]]  ;;  %s2243_s13 = smov [#allocation7]  }
  0x16   : > { %p2337_p8 = pnand %p1829_p5, %p209_p7  ;;  %s231_s14 = sshll.u32 %s2243_s13, 4  ;;  %s232_s14 = int_to_ptr.vmem [resolvable:$true] %s231_s14 }
  0x17   : > { %s3214_s5 = sld [smem:[#allocation23_spill]]  ;;  %s3200_s18 = smov 128  }
  0x18   : > { %p1996_p9 = pneg %p2337_p8  ;;  %s3201_s19 = smov 8  }
  0x19   : > { %s2246_s20 = smov [#allocation9]   ;;  %s3215_s6 = sld [smem:[#allocation24_spill]] }
  0x1a   : > { %p1997_p10 = pnand %p1996_p9, %p47_p1  ;;  %s2247_s29 = smov [#allocation10]  }
  0x1b   : > { %s229_s11 = sshll.u32 %s3212_s4, 4  ;;  %s2356_s9 = sadd.s32 1, %s2241_s27   ;;  %s230_s11 = int_to_ptr.hbm [resolvable:$true] %s229_s11 }
  0x1c   : > { %1999 = dma.hbm_to_vmem [thread:$0]  (!%p1997_p10), %s230_s11, 1024, %s232_s14, [#allocation8], %s3200_s18, %s3200_s18, %s3201_s19  }
  0x1d   : > { %s244_s17 = sshll.u32 %s3214_s5, 4  ;;  %s30_s10 = ssub.s32 %s2241_s27, %s2356_s9  ;;  %s245_s17 = int_to_ptr.vmem [resolvable:$true] %s244_s17 }
  0x1e   : > { %2002 = dma.vmem_to_smem (!%p1997_p10), %s245_s17, 64, %s2246_s20, [#allocation6]  }
  0x1f   : > { %s254_s23 = sshll.u32 %s3215_s6, 4  ;;  %s33_s13 = sadd.s32 1, %s2237_s26  ;;  %s255_s23 = int_to_ptr.hbm [resolvable:$true] %s254_s23 }
  0x20   : > { %2005 = dma.hbm_to_smem (!%p1997_p10), %s255_s23, 16, %s2247_s29, [#allocation5]  }
  0x21   : > { %p31_p12 = scmp.eq.s32.totalorder %s30_s10, 0  ;;  %p40_p13 = scmp.ne.s32.totalorder %s2237_s26, %s2233_s25 }
  0x22   : > { %p41_p0 = scmp.eq.s32.totalorder %s2241_s27, 0  ;;  %p2017_p5 = scmp.lt.s32.totalorder %s2241_s27, 2 }
  0x23   : > { %s2365_s11 = scalar_select %p31_p12, %s2237_s26, %s33_s13  }
  0x24   : > { %p2369_p3 = por %p196_p2, %p40_p13  ;;  %s265_s15 = sand.u32 1, %s2237_s26  }
  0x25   : > { %3216 = sst [smem:[#allocation17_spill]] %s2365_s11  ;;  %s1978_s16 = sshll.u32 %s2241_s27, 6 }
  0x26   : > { %p42_p7 = por %p41_p0, %p40_p13  ;;  %s1834_s17 = sshll.u32 %s265_s15, 6 }
  0x27   : > { %s3218_s0 = sld [smem:[#allocation18_spill]]  ;;  %s269_s29 = scalar_lea.vmem [#allocation2], %s1834_s17 }
  0x28   : > { %s277_s10 = sshll.u32 %s269_s29, 4  ;;  %p2379_p9 = pnand %p2017_p5, %p42_p7  ;;  %s278_s10 = int_to_ptr.vmem [resolvable:$true] %s277_s10 }
  0x29   : > { %s266_s18 = scalar_lea.sflag [#allocation3], %s265_s15 }
  0x2a   : > { %p2137_p10 = pneg %p2379_p9 }
  0x2d   : > { %s274_s22 = scalar_lea.hbm %s3218_s0, %s1978_s16  ;;  %s2140_s17 = scalar_lea.hbm %s3218_s0, 128 }
  0x2e   : > { %s275_s23 = sshll.u32 %s274_s22, 4  ;;  %s276_s23 = int_to_ptr.hbm [resolvable:$true] %s275_s23 }
  0x2f   : > { %s2133_s19 = sshra.s32 %s276_s23, 4  ;;  %s2134_s19 = int_to_ptr.hbm [resolvable:$true] %s2133_s19 }
  0x30   : > { %s2135_s4 = scalar_lea.hbm %s2134_s19, 64  ;;  %p2141_p0 = scmp.lt.s32.totalorder %s2134_s19, %s3218_s0 }
  0x31   : > { %p2136_p2 = scmp.ne.s32.totalorder %s2134_s19, %s2135_s4  ;;  %p2142_p5 = scmp.lt.s32.totalorder %s2140_s17, %s2135_s4 }
  0x33   : > { %p2138_p12 = pnand %p2137_p10, %p2136_p2  ;;  %p2143_p7 = por %p2142_p5, %p2141_p0 }
  0x35   : > { %p2139_p13 = pneg %p2138_p12 }
  0x37   : > { %p2144_p11 = pnand %p2143_p7, %p2139_p13 }
  0x39   : > { %2147 = shalt.err (!%p2144_p11)
}
  0x3a   : > { %s3220_s15 = smov 8   ;;  %s3221_s29 = smov 128  }
  0x3b   : > { %2009 = dma.hbm_to_vmem [thread:$0]  (!%p2379_p9), %s276_s23, 1024, %s278_s10, %s266_s18, %s3221_s29, %s3221_s29, %s3220_s15  }
  0x3c   : > { %289 = sbr.rel (%p2337_p8) target bundleno = 995 (0x3e3), region = 48  ;;  %s2399_s16 = sand.u32 (!%p2337_p8), 1, %s2233_s25  }
  0x3d   : > { %s3202_s4 = sshll.u32 (!%p2337_p8), %s2399_s16, 6  ;;  %s292_s19 = scalar_lea.sflag (!%p2337_p8), [#allocation3], %s2399_s16 }
  0x3e   : > { %s2405_s20 = scalar_lea.vmem (!%p2337_p8), [#allocation2], %s3202_s4 }
  0x41   : > { %2208 = dma.done.wait (%p2324_p4), %s292_s19, 1024  }
  0x42   : > { %2210 = vsyncadd (%p2324_p4), %s292_s19, 4294966272 }
  0x43   : > { %2212 = dma.done.wait (%p47_p1), [#allocation8], 1024  }
  0x44   : > { %2214 = vsyncadd (%p47_p1), [#allocation8], 4294966272 }
  0x45   : > { %2216 = dma.done.wait (%p47_p1), [#allocation6], 64  }
  0x46   : > { %2218 = vsyncadd (%p47_p1), [#allocation6], 4294967232 }
  0x47   : > { %2220 = dma.done.wait (%p47_p1), [#allocation5], 16  }
  0x48   : > { %2222 = vsyncadd (%p47_p1), [#allocation5], 4294967280 }
  0x49   : > { %316 = sfence }
  0x4a   : > { %v349_v0 = vld [vmem:[%s2405_s20 + $0x30] sm:$0xff]  ;;  %v350_v1 = vld [vmem:[%s2405_s20 + $0x38] sm:$0xff]  ;;  %vm359_vm0 = vcmask 1041408   ;;  %v347_v2 = vld [vmem:[%s2405_s20 + $0x20] sm:$0xff]  ;;  %vm400_vm1 = vcmask 1046528   ;;  %s2248_s30 = smov 16  }
  0x4b   : > { %v369_v3 = vrot.slane %v349_v0, 6  ;;  %v370_v4 = vrot.slane %v350_v1, 6  ;;  %v348_v5 = vld [vmem:[%s2405_s20 + $0x28] sm:$0xff]  ;;  %v366_v6 = vrot.slane %v347_v2, 6  ;;  %vm490_vm2 = vcmask 1044480   ;;  %s2249_s12 = smov 32  }
  0x4c   : > { %v367_v7 = vrot.slane %v348_v5, 6  ;;  %vm445_vm3 = vcmask 1045504   ;;  %s2250_s18 = smov 48   ;;  %vm535_vm4 = vcmask 1043456   ;;  %s2251_s23 = smov 64   ;;  %v343_v39 = vld [vmem:[%s2405_s20] sm:$0xff] }
  0x4d   : > { %v2428_v8 = vsel %vm359_vm0, %v369_v3, %v370_v4  ;;  %v2431_v9 = vsel %vm359_vm0, 0.0, %v369_v3  ;;  %v2434_v10 = vsel %vm359_vm0, 0.0, %v366_v6  ;;  %v391_v37 = vsel %vm359_vm0, %v370_v4, 0.0  ;;  %v344_v40 = vld [vmem:[%s2405_s20 + $0x8] sm:$0xff]  ;;  %v345_v48 = vld [vmem:[%s2405_s20 + $0x10] sm:$0xff]  ;;  %v346_v49 = vld [vmem:[%s2405_s20 + $0x18] sm:$0xff] }
  0x4e   : > { %v416_v11 = vrot.slane %v2431_v9, 1  ;;  %v417_v12 = vrot.slane %v2428_v8, 1  ;;  %v2439_v13 = vsel %vm359_vm0, %v366_v6, %v367_v7  ;;  %v411_v14 = vrot.slane %v2434_v10, 1  ;;  %s3222_s1 = sld [smem:[#allocation19_spill]] }
  0x4f   : > { %v412_v15 = vrot.slane %v2439_v13, 1  ;;  %v501_v18 = vrot.slane %v2434_v10, 3  ;;  %v502_v19 = vrot.slane %v2439_v13, 3  ;;  %v456_v20 = vrot.slane %v2434_v10, 2  ;;  %s3223_s3 = sld [smem:[#allocation21_spill]] }
  0x50   : > { %v418_v16 = vsel %vm400_vm1, %v416_v11, %v417_v12  ;;  %v457_v21 = vrot.slane %v2439_v13, 2  ;;  %v461_v22 = vrot.slane %v2431_v9, 2  ;;  %v462_v23 = vrot.slane %v2428_v8, 2  ;;  %s3224_s2 = sld [smem:[#allocation20_spill]] }
  0x51   : > { %433 = vrot.lane.b32.xlu1 %v418_v16, %s2248_s30  ;;  %v413_v17 = vsel %vm400_vm1, %v411_v14, %v412_v15  ;;  %v503_v25 = vsel %vm490_vm2, %v501_v18, %v502_v19  ;;  %v547_v27 = vrot.slane %v2439_v13, 4  ;;  %v546_v28 = vrot.slane %v2434_v10, 4  ;;  %s3030_s10 = sld [smem:[#allocation9 + $0x2]] }
  0x52   : > { %429 = vrot.lane.b32.xlu0 %v413_v17, %s2248_s30  ;;  %v463_v24 = vsel %vm445_vm3, %v461_v22, %v462_v23  ;;  %v458_v26 = vsel %vm445_vm3, %v456_v20, %v457_v21  ;;  %v551_v29 = vrot.slane %v2431_v9, 4  ;;  %v552_v30 = vrot.slane %v2428_v8, 4  ;;  %s3032_s13 = sld [smem:[#allocation9 + $0x82]] }
  0x53   : > { %478 = vrot.lane.b32.xlu2 %v463_v24, %s2249_s12  ;;  %v506_v31 = vrot.slane %v2431_v9, 3  ;;  %v507_v32 = vrot.slane %v2428_v8, 3  ;;  %v548_v33 = vsel %vm535_vm4, %v546_v28, %v547_v27  ;;  %v390_v35 = vsel %vm359_vm0, %v367_v7, 0.0  ;;  %s3034_s17 = sld [smem:[#allocation9 + $0x102]] }
  0x54   : > { %v553_v34 = vsel %vm535_vm4, %v551_v29, %v552_v30  ;;  %v414_v38 = vrot.slane %v390_v35, 1  ;;  %v419_v41 = vrot.slane %v391_v37, 1  ;;  %v459_v42 = vrot.slane %v390_v35, 2  ;;  %s3036_s21 = sld [smem:[#allocation9 + $0x182]] }
  0x55   : > { %v508_v36 = vsel %vm490_vm2, %v506_v31, %v507_v32  ;;  %v360_v44 = vrot.slane %v343_v39, 6  ;;  %v361_v45 = vrot.slane %v344_v40, 6  ;;  %v504_v50 = vrot.slane %v390_v35, 3  ;;  %v645_v40 = vld [vmem:[%s3222_s1 + $0xe8] sm:$0xff]  ;;  %s3038_s22 = sld [smem:[#allocation9 + $0x3]] }
  0x56   : > { %v415_v43 = vsel %vm400_vm1, %v412_v15, %v414_v38  ;;  %v420_v46 = vsel %vm400_vm1, %v417_v12, %v419_v41  ;;  %v460_v47 = vsel %vm445_vm3, %v457_v21, %v459_v42  ;;  %v549_v52 = vrot.slane %v390_v35, 4  ;;  %v644_v41 = vld [vmem:[%s3222_s1 + $0xe0] sm:$0xff]  ;;  %727 = vmatpush.msra.mxu2 %v645_v40  ;;  %v619_v40 = vld [vmem:[%s3222_s1 + $0x18] sm:$0xff]  ;;  %s3040_s15 = sld [smem:[#allocation9 + $0x83]] }
  0x57   : > { %v2482_v51 = vsel %vm359_vm0, %v360_v44, %v361_v45  ;;  %v464_v53 = vrot.slane %v391_v37, 2  ;;  %v363_v54 = vrot.slane %v345_v48, 6  ;;  %v364_v55 = vrot.slane %v346_v49, 6  ;;  %v642_v49 = vld [vmem:[%s3222_s1 + $0xd0] sm:$0xff]  ;;  %s3044_s29 = sld [smem:[#allocation9 + $0x183]] }
  0x58   : > { %v388_v56 = vsel %vm359_vm0, %v361_v45, 0.0  ;;  %v402_v57 = vrot.slane %v2482_v51, 1  ;;  %v505_v58 = vsel %vm490_vm2, %v502_v19, %v504_v50  ;;  %v550_v61 = vsel %vm535_vm4, %v547_v27, %v549_v52  ;;  %728 = vmatpush.msra.mxu2 %v644_v41  ;;  %v629_v41 = vld [vmem:[%s3222_s1 + $0x68] sm:$0xff]  ;;  %s3048_s19 = sld [smem:[#allocation9 + $0x80]] }
  0x59   : > { %519 = vrot.lane.b32.xlu1 %v503_v25, %s2250_s18  ;;  %v404_v59 = vrot.slane %v388_v56, 1  ;;  %v465_v62 = vsel %vm445_vm3, %v462_v23, %v464_v53  ;;  %v2495_v63 = vsel %vm359_vm0, %v363_v54, %v364_v55  ;;  %v389_v0 = vsel %vm359_vm0, %v364_v55, 0.0  ;;  %v654_v55 = vld [vmem:[%s3222_s1 + $0x130] sm:$0xff]  ;;  %s3054_s4 = sld [smem:[#allocation9 + $0x1]] }
  0x5a   : > { %474 = vrot.lane.b32.xlu0 %v458_v26, %s2249_s12  ;;  %v2500_v1 = vsel %vm359_vm0, 0.0, %v360_v44  ;;  %v509_v2 = vrot.slane %v391_v37, 3  ;;  %v407_v3 = vrot.slane %v2495_v63, 1  ;;  %v409_v4 = vrot.slane %v389_v0, 1  ;;  %v655_v44 = vld [vmem:[%s3222_s1 + $0x138] sm:$0xff]  ;;  %s3056_s0 = sld [smem:[#allocation9 + $0x81]] }
  0x5b   : > { %564 = vrot.lane.b32.xlu2 %v548_v33, %s2251_s23  ;;  %v2490_v60 = vsel %vm400_vm1, %v402_v57, %v404_v59  ;;  %v401_v6 = vrot.slane %v2500_v1, 1  ;;  %v452_v7 = vrot.slane %v2495_v63, 2  ;;  %v454_v11 = vrot.slane %v389_v0, 2  ;;  %756 = vmatpush.msra.mxu3 %v655_v44  ;;  %v652_v59 = vld [vmem:[%s3222_s1 + $0x120] sm:$0xff]  ;;  %v617_v44 = vld [vmem:[%s3222_s1 + $0x8] sm:$0xff]  ;;  %s3064_s5 = sld [smem:[#allocation10 + $0x1]] }
  0x5c   : > { %v410_v5 = vsel %vm400_vm1, %v407_v3, %v409_v4  ;;  %v554_v12 = vrot.slane %v391_v37, 4  ;;  %v510_v14 = vsel %vm490_vm2, %v507_v32, %v509_v2  ;;  %v2512_v17 = vsel %vm359_vm0, 0.0, %v363_v54  ;;  %v641_v54 = vld [vmem:[%s3222_s1 + $0xc8] sm:$0xff]  ;;  %v636_v2 = vld [vmem:[%s3222_s1 + $0xa0] sm:$0xff]  ;;  %s3066_s6 = sld [smem:[#allocation10 + $0x2]] }
  0x5d   : > { %v455_v15 = vsel %vm445_vm3, %v452_v7, %v454_v11  ;;  %v403_v16 = vsel %vm400_vm1, %v401_v6, %v402_v57  ;;  %v406_v19 = vrot.slane %v2512_v17, 1  ;;  %v492_v20 = vrot.slane %v2482_v51, 3  ;;  %v653_v57 = vld [vmem:[%s3222_s1 + $0x128] sm:$0xff]  ;;  %757 = vmatpush.msra.mxu3 %v654_v55  ;;  %v648_v4 = vld [vmem:[%s3222_s1 + $0x100] sm:$0xff]  ;;  %s3068_s11 = sld [smem:[#allocation10 + $0x3]] }
  0x5e   : > { %v555_v18 = vsel %vm535_vm4, %v552_v30, %v554_v12  ;;  %v494_v21 = vrot.slane %v388_v56, 3  ;;  %v451_v23 = vrot.slane %v2512_v17, 2  ;;  %v537_v24 = vrot.slane %v2482_v51, 4 }
  0x5f   : > { %v539_v25 = vrot.slane %v388_v56, 4  ;;  %v446_v26 = vrot.slane %v2500_v1, 2  ;;  %v447_v27 = vrot.slane %v2482_v51, 2  ;;  %v408_v28 = vsel %vm400_vm1, %v406_v19, %v407_v3  ;;  %758 = vmatpush.msra.mxu3 %v653_v57  ;;  %v649_v3 = vld [vmem:[%s3222_s1 + $0x108] sm:$0xff] }
  0x60   : > { %v495_v22 = vsel %vm490_vm2, %v492_v20, %v494_v21  ;;  %v453_v30 = vsel %vm445_vm3, %v451_v23, %v452_v7  ;;  %v491_v32 = vrot.slane %v2500_v1, 3  ;;  %v542_v33 = vrot.slane %v2495_v63, 4  ;;  %v646_v7 = vld [vmem:[%s3222_s1 + $0xf0] sm:$0xff] }
  0x61   : > { %568 = vrot.lane.b32.xlu1 %v553_v34, %s2251_s23  ;;  %v540_v29 = vsel %vm535_vm4, %v537_v24, %v539_v25  ;;  %v448_v31 = vsel %vm445_vm3, %v446_v26, %v447_v27  ;;  %v544_v34 = vrot.slane %v389_v0, 4  ;;  %v536_v37 = vrot.slane %v2500_v1, 4  ;;  %759 = vmatpush.msra.mxu3 %v652_v59  ;;  %v634_v23 = vld [vmem:[%s3222_s1 + $0x90] sm:$0xff]  ;;  %v633_v26 = vld [vmem:[%s3222_s1 + $0x88] sm:$0xff] }
  0x62   : > { %523 = vrot.lane.b32.xlu0 %v508_v36, %s2250_s18  ;;  %v497_v36 = vrot.slane %v2495_v63, 3  ;;  %v449_v38 = vrot.slane %v388_v56, 2  ;;  %v499_v39 = vrot.slane %v389_v0, 3  ;;  %v496_v42 = vrot.slane %v2512_v17, 3  ;;  %v640_v56 = vld [vmem:[%s3222_s1 + $0xc0] sm:$0xff]  ;;  %v650_v0 = vld [vmem:[%s3222_s1 + $0x110] sm:$0xff] }
  0x63   : > { %431 = vrot.lane.b32.xlu2 %v415_v43, %s2248_s30  ;;  %v545_v35 = vsel %vm535_vm4, %v542_v33, %v544_v34  ;;  %v493_v43 = vsel %vm490_vm2, %v491_v32, %v492_v20  ;;  %v538_v48 = vsel %vm535_vm4, %v536_v37, %v537_v24  ;;  %v541_v52 = vrot.slane %v2512_v17, 4  ;;  %v620_v37 = vld [vmem:[%s3222_s1 + $0x20] sm:$0xff] }
  0x64   : > { %v450_v45 = vsel %vm445_vm3, %v447_v27, %v449_v38  ;;  %v498_v50 = vsel %vm490_vm2, %v496_v42, %v497_v36  ;;  %vm580_vm5 = vcmask 130048   ;;  %vm598_vm6 = vcmask 392192   ;;  %v622_v27 = vld [vmem:[%s3222_s1 + $0x30] sm:$0xff] }
  0x65   : > { %v543_v53 = vsel %vm535_vm4, %v541_v52, %v542_v33  ;;  %vm589_vm7 = vcmask 261120   ;;  %vm607_vm8 = vcmask 523264   ;;  %vm656_vm9 = vcmask 654336   ;;  %v618_v42 = vld [vmem:[%s3222_s1 + $0x10] sm:$0xff] }
  0x66   : > { %v626_v52 = vld [vmem:[%s3222_s1 + $0x50] sm:$0xff] }
  0x69   : > { %435 = vrot.lane.b32.xlu1 %v420_v46, %s2248_s30  ;;  %v500_v46 = vsel %vm490_vm2, %v497_v36, %v499_v39 }
  0x6a   : > { %476 = vrot.lane.b32.xlu0 %v460_v47, %s2249_s12  ;;  %v643_v47 = vld [vmem:[%s3222_s1 + $0xd8] sm:$0xff] }
  0x6b   : > { %521 = vrot.lane.b32.xlu2 %v505_v58, %s2250_s18  ;;  %729 = vmatpush.msra.mxu2 %v643_v47  ;;  %v639_v58 = vld [vmem:[%s3222_s1 + $0xb8] sm:$0xff] }
  0x6d   : > { %730 = vmatpush.msra.mxu2 %v642_v49 }
  0x6f   : > { %731 = vmatpush.msra.mxu2 %v641_v54 }
  0x71   : > { %566 = vrot.lane.b32.xlu1 %v550_v61, %s2251_s23  ;;  %732 = vmatpush.msra.mxu2 %v640_v56  ;;  %v651_v61 = vld [vmem:[%s3222_s1 + $0x118] sm:$0xff] }
  0x72   : > { %480 = vrot.lane.b32.xlu0 %v465_v62, %s2249_s12  ;;  %760 = vmatpush.msra.mxu3 %v651_v61  ;;  %v637_v62 = vld [vmem:[%s3222_s1 + $0xa8] sm:$0xff] }
  0x73   : > { %525 = vrot.lane.b32.xlu2 %v510_v14, %s2250_s18  ;;  %733 = vmatpush.msra.mxu2 %v639_v58 }
  0x74   : > { %761 = vmatpush.msra.mxu3 %v650_v0 }
  0x76   : > { %762 = vmatpush.msra.mxu3 %v649_v3 }
  0x78   : > { %763 = vmatpush.msra.mxu3 %v648_v4 }
  0x79   : > { %421 = vrot.lane.b32.xlu1 %v403_v16, %s2248_s30  ;;  %v635_v16 = vld [vmem:[%s3222_s1 + $0x98] sm:$0xff] }
  0x7a   : > { %570 = vrot.lane.b32.xlu0 %v555_v18, %s2251_s23  ;;  %698 = vmatpush.msra.mxu1 %v635_v16 }
  0x7b   : > { %425 = vrot.lane.b32.xlu2 %v408_v28, %s2248_s30 }
  0x7c   : > { %699 = vmatpush.msra.mxu1 %v634_v23 }
  0x7e   : > { %700 = vmatpush.msra.mxu1 %v633_v26 }
  0x81   : > { %470 = vrot.lane.b32.xlu1 %v453_v30, %s2249_s12  ;;  %v621_v30 = vld [vmem:[%s3222_s1 + $0x28] sm:$0xff] }
  0x82   : > { %466 = vrot.lane.b32.xlu0 %v448_v31, %s2249_s12  ;;  %v631_v31 = vld [vmem:[%s3222_s1 + $0x78] sm:$0xff] }
  0x83   : > { %511 = vrot.lane.b32.xlu2 %v493_v43, %s2250_s18  ;;  %v628_v43 = vld [vmem:[%s3222_s1 + $0x60] sm:$0xff] }
  0x89   : > { %556 = vrot.lane.b32.xlu1 %v538_v48, %s2251_s23  ;;  %v616_v48 = vld [vmem:[%s3222_s1] sm:$0xff] }
  0x8a   : > { %515 = vrot.lane.b32.xlu0 %v498_v50, %s2250_s18 }
  0x8b   : > { %560 = vrot.lane.b32.xlu2 %v543_v53, %s2251_s23 }
  0x91   : > { %427 = vrot.lane.b32.xlu1 %v410_v5, %s2248_s30  ;;  %v647_v5 = vld [vmem:[%s3222_s1 + $0xf8] sm:$0xff] }
  0x92   : > { %423 = vrot.lane.b32.xlu0 %v2490_v60, %s2248_s30  ;;  %v638_v60 = vld [vmem:[%s3222_s1 + $0xb0] sm:$0xff]  ;;  %764 = vmatpush.msra.mxu3 %v647_v5  ;;  %v794_v5 = vld [vmem:[%s3223_s3 + $0x28] sm:$0xff]  ;;  %s3042_s30 = sld [smem:[#allocation9 + $0x103]] }
  0x93   : > { %468 = vrot.lane.b32.xlu2 %v450_v45, %s2249_s12  ;;  %734 = vmatpush.msra.mxu2 %v638_v60  ;;  %v627_v45 = vld [vmem:[%s3222_s1 + $0x58] sm:$0xff] }
  0x94   : > { %765 = vmatpush.msra.mxu3 %v646_v7  ;;  %v793_v7 = vld [vmem:[%s3223_s3 + $0x20] sm:$0xff] }
  0x95   : > { %735 = vmatpush.msra.mxu2 %v637_v62 }
  0x97   : > { %736 = vmatpush.msra.mxu2 %v636_v2 }
  0x99   : > { %513 = vrot.lane.b32.xlu1 %v495_v22, %s2250_s18  ;;  %v624_v22 = vld [vmem:[%s3222_s1 + $0x40] sm:$0xff]  ;;  %1859 = vmatpush.xpose.msk.msrb.mxu2 %vm580_vm5, %v794_v5 }
  0x9a   : > { %472 = vrot.lane.b32.xlu0 %v455_v15, %s2249_s12  ;;  %v625_v15 = vld [vmem:[%s3222_s1 + $0x48] sm:$0xff]  ;;  %v1875_v5 = vld [vmem:[%s3223_s3 + $0x40] sm:$0xff]  ;;  %s3046_s12 = sld [smem:[#allocation9]] }
  0x9b   : > { %517 = vrot.lane.b32.xlu2 %v500_v46, %s2250_s18  ;;  %669 = vmatpush.msra.mxu0 %v625_v15  ;;  %s3050_s18 = sld [smem:[#allocation9 + $0x100]] }
  0x9d   : > { %670 = vmatpush.msra.mxu0 %v624_v22  ;;  %1860 = vmatpush.xpose.msk.msrb.mxu2 %vm580_vm5, %v793_v7 }
  0xa1   : > { %562 = vrot.lane.b32.xlu1 %v545_v35, %s2251_s23 }
  0xa2   : > { %558 = vrot.lane.b32.xlu0 %v540_v29, %s2251_s23  ;;  %v632_v29 = vld [vmem:[%s3222_s1 + $0x80] sm:$0xff]  ;;  %s3052_s23 = sld [smem:[#allocation9 + $0x180]] }
  0xa3   : > { %701 = vmatpush.msra.mxu1 %v632_v29 }
  0xa5   : > { %702 = vmatpush.msra.mxu1 %v631_v31 }
  0xad   : > { %v479_v6 = vpop.permute.xlu2 %478 }
  0xb5   : > { %v565_v11 = vpop.permute.xlu2 %564 }
  0xbd   : > { %v432_v18 = vpop.permute.xlu2 %431 }
  0xbe   : > { %v586_v49 = vsel %vm580_vm5, %v2439_v13, %v432_v18 }
  0xc3   : > { %v434_v12 = vpop.permute.xlu1 %433 }
  0xc4   : > { %v430_v14 = vpop.permute.xlu0 %429  ;;  %v587_v32 = vsel %vm580_vm5, %v2431_v9, %v434_v12  ;;  %v630_v9 = vld [vmem:[%s3222_s1 + $0x70] sm:$0xff] }
  0xc5   : > { %v585_v20 = vsel %vm580_vm5, %v2434_v10, %v430_v14  ;;  %v623_v10 = vld [vmem:[%s3222_s1 + $0x38] sm:$0xff]  ;;  %v522_v34 = vpop.permute.xlu2 %521  ;;  %v596_v35 = vsel %vm589_vm7, %v587_v32, %v479_v6  ;;  %703 = vmatpush.msra.mxu1 %v630_v9  ;;  %v791_v9 = vld [vmem:[%s3223_s3 + $0x10] sm:$0xff]  ;;  %s3058_s1 = sld [smem:[#allocation9 + $0x101]] }
  0xc6   : > { %671 = vmatpush.msra.mxu0 %v623_v10 }
  0xc7   : > { %704 = vmatpush.msra.mxu1 %v629_v41 }
  0xc8   : > { %672 = vmatpush.msra.mxu0 %v622_v27 }
  0xc9   : > { %705 = vmatpush.msra.mxu1 %v628_v43 }
  0xca   : > { %673 = vmatpush.msra.mxu0 %v621_v30 }
  0xcb   : > { %v520_v19 = vpop.permute.xlu1 %519  ;;  %706 = vmatpush.msra.mxu1 %v627_v45 }
  0xcc   : > { %v475_v21 = vpop.permute.xlu0 %474  ;;  %674 = vmatpush.msra.mxu0 %v620_v37 }
  0xcd   : > { %v594_v24 = vsel %vm589_vm7, %v585_v20, %v475_v21  ;;  %v526_v50 = vpop.permute.xlu2 %525  ;;  %707 = vmatpush.msra.mxu1 %v626_v52  ;;  %v1879_v52 = vld [vmem:[%s3223_s3 + $0x60] sm:$0xff] }
  0xce   : > { %v603_v25 = vsel %vm598_vm6, %v594_v24, %v520_v19  ;;  %675 = vmatpush.msra.mxu0 %v619_v40 }
  0xcf   : > { %v612_v28 = vsel %vm607_vm8, %v603_v25, %v565_v11 }
  0xd0   : > { %1847 = vmatmul.msk.f32.vlgmr.msra.gmra.mxu2 %vm656_vm9, %v612_v28  ;;  %676 = vmatpush.msra.mxu0 %v618_v42 }
  0xd2   : > { %677 = vmatpush.msra.mxu0 %v617_v44 }
  0xd3   : > { %v569_v33 = vpop.permute.xlu1 %568 }
  0xd4   : > { %v524_v36 = vpop.permute.xlu0 %523  ;;  %678 = vmatpush.msra.mxu0 %v616_v48 }
  0xd5   : > { %v605_v38 = vsel %vm598_vm6, %v596_v35, %v524_v36  ;;  %v426_v58 = vpop.permute.xlu2 %425  ;;  %v790_v35 = vld [vmem:[%s3223_s3 + $0x8] sm:$0xff]  ;;  %v792_v36 = vld [vmem:[%s3223_s3 + $0x18] sm:$0xff] }
  0xd6   : > { %v614_v39 = vsel %vm607_vm8, %v605_v38, %v569_v33  ;;  %v583_v11 = vsel %vm580_vm5, %v2512_v17, %v426_v58  ;;  %1851 = vmatpush.xpose.msk.msrb.mxu0 %vm580_vm5, %v790_v35  ;;  %1855 = vmatpush.xpose.msk.msrb.mxu1 %vm580_vm5, %v792_v36  ;;  %v789_v38 = vld [vmem:[%s3223_s3] sm:$0xff]  ;;  %v944_v58 = vld [vmem:[%s3224_s2 + $0x38] sm:$0xff]  ;;  %v1917_v35 = vld [vmem:[%s3223_s3 + $0x90] sm:$0xff] }
  0xd7   : > { %1849 = vmatmul.msk.f32.vlgmr.msra.gmra.mxu3 %vm656_vm9, %v614_v39  ;;  %v1915_v36 = vld [vmem:[%s3223_s3 + $0x80] sm:$0xff] }
  0xda   : > { %1852 = vmatpush.xpose.msk.msrb.mxu0 %vm580_vm5, %v789_v38  ;;  %1856 = vmatpush.xpose.msk.msrb.mxu1 %vm580_vm5, %v791_v9  ;;  %v1902_v38 = vld [vmem:[%s3224_s2 + $0x58] sm:$0xff]  ;;  %v1900_v9 = vld [vmem:[%s3224_s2 + $0x48] sm:$0xff] }
  0xdb   : > { %v436_v46 = vpop.permute.xlu1 %435 }
  0xdc   : > { %v477_v47 = vpop.permute.xlu0 %476  ;;  %v588_v13 = vsel %vm580_vm5, %v2428_v8, %v436_v46 }
  0xdd   : > { %v595_v53 = vsel %vm589_vm7, %v586_v49, %v477_v47  ;;  %v512_v2 = vpop.permute.xlu2 %511  ;;  %v941_v49 = vld [vmem:[%s3224_s2 + $0x20] sm:$0xff] }
  0xde   : > { %v604_v54 = vsel %vm598_vm6, %v595_v53, %v522_v34 }
  0xe3   : > { %v567_v55 = vpop.permute.xlu1 %566 }
  0xe4   : > { %v481_v56 = vpop.permute.xlu0 %480  ;;  %v613_v57 = vsel %vm607_vm8, %v604_v54, %v567_v55  ;;  %v942_v54 = vld [vmem:[%s3224_s2 + $0x28] sm:$0xff]  ;;  %v943_v55 = vld [vmem:[%s3224_s2 + $0x30] sm:$0xff] }
  0xe5   : > { %1848 = vmatmul.msk.f32.gmra.mxu2 %vm656_vm9, %v613_v57  ;;  %v597_v59 = vsel %vm589_vm7, %v588_v13, %v481_v56  ;;  %v561_v15 = vpop.permute.xlu2 %560  ;;  %v1882_v56 = vld [vmem:[%s3223_s3 + $0x78] sm:$0xff]  ;;  %v1881_v57 = vld [vmem:[%s3223_s3 + $0x70] sm:$0xff] }
  0xe6   : > { %v606_v61 = vsel %vm598_vm6, %v597_v59, %v526_v50  ;;  %v1880_v50 = vld [vmem:[%s3223_s3 + $0x68] sm:$0xff] }
  0xeb   : > { %v422_v60 = vpop.permute.xlu1 %421 }
  0xec   : > { %v571_v62 = vpop.permute.xlu0 %570  ;;  %v581_v8 = vsel %vm580_vm5, %v2500_v1, %v422_v60 }
  0xed   : > { %v615_v0 = vsel %vm607_vm8, %v606_v61, %v571_v62  ;;  %v469_v22 = vpop.permute.xlu2 %468  ;;  %v939_v62 = vld [vmem:[%s3224_s2 + $0x10] sm:$0xff] }
  0xee   : > { %1850 = vmatmul.msk.f32.gmra.mxu3 %vm656_vm9, %v615_v0  ;;  %v937_v0 = vld [vmem:[%s3224_s2] sm:$0xff] }
  0xf3   : > { %v471_v3 = vpop.permute.xlu1 %470 }
  0xf4   : > { %v467_v4 = vpop.permute.xlu0 %466  ;;  %v592_v16 = vsel %vm589_vm7, %v583_v11, %v471_v3  ;;  %v1876_v3 = vld [vmem:[%s3223_s3 + $0x48] sm:$0xff] }
  0xf5   : > { %v590_v6 = vsel %vm589_vm7, %v581_v8, %v467_v4  ;;  %v518_v27 = vpop.permute.xlu2 %517  ;;  %v1877_v4 = vld [vmem:[%s3223_s3 + $0x50] sm:$0xff]  ;;  %v940_v8 = vld [vmem:[%s3224_s2 + $0x18] sm:$0xff] }
  0xf6   : > { %v599_v12 = vsel %vm598_vm6, %v590_v6, %v512_v2  ;;  %v1878_v2 = vld [vmem:[%s3223_s3 + $0x58] sm:$0xff]  ;;  %v938_v6 = vld [vmem:[%s3224_s2 + $0x8] sm:$0xff] }
  0xfb   : > { %v557_v14 = vpop.permute.xlu1 %556 }
  0xfc   : > { %v516_v1 = vpop.permute.xlu0 %515  ;;  %v608_v18 = vsel %vm607_vm8, %v599_v12, %v557_v14 }
  0xfd   : > { %v601_v19 = vsel %vm598_vm6, %v592_v16, %v516_v1  ;;  %1843 = vmatmul.msk.f32.vlgmr.msra.gmra.mxu0 %vm656_vm9, %v608_v18  ;;  %v1903_v18 = vld [vmem:[%s3224_s2 + $0x60] sm:$0xff] }
  0xfe   : > { %v610_v20 = vsel %vm607_vm8, %v601_v19, %v561_v15  ;;  %v1920_v19 = vld [vmem:[%s3223_s3 + $0xa8] sm:$0xff] }
  0xff   : > { %1845 = vmatmul.msk.f32.vlgmr.msra.gmra.mxu1 %vm656_vm9, %v610_v20 }
 0x103   : > { %v428_v17 = vpop.permute.xlu1 %427 }
 0x104   : > { %v424_v21 = vpop.permute.xlu0 %423  ;;  %v584_v25 = vsel %vm580_vm5, %v2495_v63, %v428_v17  ;;  %v795_v63 = vld [vmem:[%s3223_s3 + $0x30] sm:$0xff]  ;;  %v1919_v17 = vld [vmem:[%s3223_s3 + $0xa0] sm:$0xff] }
 0x105   : > { %v582_v10 = vsel %vm580_vm5, %v2482_v51, %v424_v21  ;;  %v796_v51 = vld [vmem:[%s3223_s3 + $0x38] sm:$0xff] }
 0x106   : > { %v591_v28 = vsel %vm589_vm7, %v582_v10, %v469_v22  ;;  %1863 = vmatpush.xpose.msk.msrb.mxu3 %vm580_vm5, %v796_v51  ;;  %v1918_v51 = vld [vmem:[%s3223_s3 + $0x98] sm:$0xff] }
 0x10a   : > { %1864 = vmatpush.xpose.msk.msrb.mxu3 %vm580_vm5, %v795_v63  ;;  %v1916_v63 = vld [vmem:[%s3223_s3 + $0x88] sm:$0xff] }
 0x10b   : > { %v514_v23 = vpop.permute.xlu1 %513 }
 0x10c   : > { %v473_v24 = vpop.permute.xlu0 %472  ;;  %v600_v31 = vsel %vm598_vm6, %v591_v28, %v514_v23  ;;  %v1904_v23 = vld [vmem:[%s3224_s2 + $0x68] sm:$0xff]  ;;  %v1906_v28 = vld [vmem:[%s3224_s2 + $0x78] sm:$0xff] }
 0x10d   : > { %v593_v26 = vsel %vm589_vm7, %v584_v25, %v473_v24  ;;  %v1905_v24 = vld [vmem:[%s3224_s2 + $0x70] sm:$0xff]  ;;  %v1922_v25 = vld [vmem:[%s3223_s3 + $0xb8] sm:$0xff] }
 0x10e   : > { %v602_v29 = vsel %vm598_vm6, %v593_v26, %v518_v27  ;;  %v1921_v27 = vld [vmem:[%s3223_s3 + $0xb0] sm:$0xff]  ;;  %s3062_s3 = sld [smem:[#allocation10]] }
 0x113   : > { %v563_v30 = vpop.permute.xlu1 %562 }
 0x114   : > { %v559_v32 = vpop.permute.xlu0 %558  ;;  %v611_v33 = vsel %vm607_vm8, %v602_v29, %v563_v30 }
 0x115   : > { %v609_v34 = vsel %vm607_vm8, %v600_v31, %v559_v32  ;;  %1846 = vmatmul.msk.f32.gmra.mxu1 %vm656_vm9, %v611_v33  ;;  %v1901_v33 = vld [vmem:[%s3224_s2 + $0x50] sm:$0xff] }
 0x116   : > { %1844 = vmatmul.msk.f32.gmra.mxu0 %vm656_vm9, %v609_v34  ;;  %v1899_v34 = vld [vmem:[%s3224_s2 + $0x40] sm:$0xff] }
 0x153   : > { %v2748_v37 = vpop.f32.mrf.mxu2 }
 0x154   : > { %1861 = vmatmul.msk.f32.vlgmr.msrb.gmra.mxu2 %vm580_vm5, %v2748_v37 }
 0x15a   : > { %v2762_v39 = vpop.f32.mrf.mxu3 }
 0x15b   : > { %1865 = vmatmul.msk.f32.vlgmr.msrb.gmra.mxu3 %vm580_vm5, %v2762_v39 }
 0x168   : > { %v2766_v40 = vpop.f32.mrf.mxu2 }
 0x169   : > { %1862 = vmatmul.msk.f32.gmra.mxu2 %vm580_vm5, %v2766_v40 }
 0x171   : > { %v2770_v41 = vpop.f32.mrf.mxu3 }
 0x172   : > { %1866 = vmatmul.msk.f32.gmra.mxu3 %vm580_vm5, %v2770_v41 }
 0x17a   : > { %v2774_v42 = vpop.f32.mrf.mxu0 }
 0x17b   : > { %1853 = vmatmul.msk.f32.vlgmr.msrb.gmra.mxu0 %vm580_vm5, %v2774_v42 }
 0x17c   : > { %v2778_v43 = vpop.f32.mrf.mxu1 }
 0x17d   : > { %1857 = vmatmul.msk.f32.vlgmr.msrb.gmra.mxu1 %vm580_vm5, %v2778_v43 }
 0x192   : > { %v2782_v44 = vpop.f32.mrf.mxu1 }
 0x193   : > { %v2784_v45 = vpop.f32.mrf.mxu0  ;;  %1858 = vmatmul.msk.f32.gmra.mxu1 %vm580_vm5, %v2782_v44 }
 0x194   : > { %1854 = vmatmul.msk.f32.gmra.mxu0 %vm580_vm5, %v2784_v45 }
 0x1d7   : > { %v896_v46 = vpop.f32.mrf.mxu2 }
 0x1de   : > { %v931_v48 = vpop.f32.mrf.mxu3 }
 0x1ec   : > { %v899_v47 = vpop.f32.mrf.mxu2 }
 0x1ed   : > { %1023 = vmatpush.msra.mxu2 %v899_v47 }
 0x1ef   : > { %1024 = vmatpush.msra.mxu2 %v896_v46  ;;  %v777_v46 = vld [vmem:[#allocation7 + $0x20] sm:$0xff] }
 0x1f0   : > { %1871 = vmatmul.msk.f32.vlgmr.msra.gmra.mxu2 %vm580_vm5, %v941_v49  ;;  %v785_v47 = vadd.f32 %v777_v46, %v2748_v37  ;;  %v1630_v46 = vstv %s3040_s15 }
 0x1f1   : > { %1891 = vmatpush.xpose.msk.msrb.mxu2 %vm580_vm5, %v1880_v50 }
 0x1f5   : > { %v934_v53 = vpop.f32.mrf.mxu3  ;;  %1892 = vmatpush.xpose.msk.msrb.mxu2 %vm580_vm5, %v1879_v52  ;;  %v778_v52 = vld [vmem:[#allocation7 + $0x28] sm:$0xff] }
 0x1f6   : > { %1052 = vmatpush.msra.mxu3 %v934_v53  ;;  %v779_v53 = vld [vmem:[#allocation7 + $0x30] sm:$0xff] }
 0x1f8   : > { %1053 = vmatpush.msra.mxu3 %v931_v48  ;;  %1872 = vmatmul.msk.f32.gmra.mxu2 %vm580_vm5, %v942_v54  ;;  %v826_v59 = vpop.f32.mrf.mxu0  ;;  %v786_v54 = vadd.f32 %v778_v52, %v2766_v40  ;;  %v1586_v52 = vstv %s3046_s12 }
 0x1f9   : > { %1873 = vmatmul.msk.f32.vlgmr.msra.gmra.mxu3 %vm580_vm5, %v943_v55  ;;  %v787_v55 = vadd.f32 %v779_v53, %v2762_v39  ;;  %v1614_v53 = vstv %s3048_s19 }
 0x1fa   : > { %1895 = vmatpush.xpose.msk.msrb.mxu3 %vm580_vm5, %v1882_v56  ;;  %v861_v13 = vpop.f32.mrf.mxu1 }
 0x1fe   : > { %1896 = vmatpush.xpose.msk.msrb.mxu3 %vm580_vm5, %v1881_v57 }
 0x200   : > { %1893 = vmatmul.msk.f32.vlgmr.msrb.gmra.mxu2 %vm580_vm5, %v2748_v37 }
 0x201   : > { %1874 = vmatmul.msk.f32.gmra.mxu3 %vm580_vm5, %v944_v58 }
 0x208   : > { %1894 = vmatmul.msk.f32.gmra.mxu2 %vm580_vm5, %v2766_v40 }
 0x209   : > { %1897 = vmatmul.msk.f32.vlgmr.msrb.gmra.mxu3 %vm580_vm5, %v2762_v39 }
 0x210   : > { %v864_v60 = vpop.f32.mrf.mxu1 }
 0x211   : > { %v829_v61 = vpop.f32.mrf.mxu0  ;;  %1898 = vmatmul.msk.f32.gmra.mxu3 %vm580_vm5, %v2770_v41  ;;  %994 = vmatpush.msra.mxu1 %v864_v60  ;;  %v780_v60 = vld [vmem:[#allocation7 + $0x38] sm:$0xff] }
 0x212   : > { %965 = vmatpush.msra.mxu0 %v829_v61  ;;  %v788_v61 = vadd.f32 %v780_v60, %v2770_v41 }
 0x213   : > { %995 = vmatpush.msra.mxu1 %v861_v13 }
 0x214   : > { %966 = vmatpush.msra.mxu0 %v826_v59  ;;  %1869 = vmatmul.msk.f32.vlgmr.msra.gmra.mxu1 %vm580_vm5, %v939_v62 }
 0x215   : > { %1867 = vmatmul.msk.f32.vlgmr.msra.gmra.mxu0 %vm580_vm5, %v937_v0  ;;  %1887 = vmatpush.xpose.msk.msrb.mxu1 %vm580_vm5, %v1878_v2 }
 0x216   : > { %1883 = vmatpush.xpose.msk.msrb.mxu0 %vm580_vm5, %v1876_v3 }
 0x219   : > { %1888 = vmatpush.xpose.msk.msrb.mxu1 %vm580_vm5, %v1877_v4 }
 0x21a   : > { %1884 = vmatpush.xpose.msk.msrb.mxu0 %vm580_vm5, %v1875_v5 }
 0x21c   : > { %1870 = vmatmul.msk.f32.gmra.mxu1 %vm580_vm5, %v940_v8 }
 0x21d   : > { %1868 = vmatmul.msk.f32.gmra.mxu0 %vm580_vm5, %v938_v6 }
 0x224   : > { %1889 = vmatmul.msk.f32.vlgmr.msrb.gmra.mxu1 %vm580_vm5, %v2778_v43 }
 0x225   : > { %1885 = vmatmul.msk.f32.vlgmr.msrb.gmra.mxu0 %vm580_vm5, %v2774_v42 }
 0x22c   : > { %1890 = vmatmul.msk.f32.gmra.mxu1 %vm580_vm5, %v2782_v44 }
 0x22d   : > { %1886 = vmatmul.msk.f32.gmra.mxu0 %vm580_vm5, %v2784_v45 }
 0x273   : > { %v2870_v7 = vpop.f32.mrf.mxu2 }
 0x274   : > { %v1065_v48 = vadd.f32 %v2870_v7, %v785_v47  ;;  %v1658_v47 = vstv %s3042_s30 }
 0x27b   : > { %v2872_v11 = vpop.f32.mrf.mxu2 }
 0x27c   : > { %v2874_v12 = vpop.f32.mrf.mxu3  ;;  %v1066_v56 = vadd.f32 %v2872_v11, %v786_v54  ;;  %v1642_v54 = vstv %s3050_s18 }
 0x27d   : > { %v1067_v57 = vadd.f32 %v2874_v12, %v787_v55  ;;  %v1670_v55 = vstv %s3052_s23 }
 0x283   : > { %v1159_v14 = vpop.f32.mrf.mxu2 }
 0x284   : > { %v2876_v15 = vpop.f32.mrf.mxu3 }
 0x285   : > { %v1068_v62 = vadd.f32 %v2876_v15, %v788_v61  ;;  %v1943_v15 = vld [vmem:[%s3224_s2 + $0xa0] sm:$0xff]  ;;  %v1608_v61 = vstv %s3062_s3  ;;  %s1706_s3 = scalar_lea.sflag [#allocation4], %s2399_s16 }
 0x28b   : > { %v1162_v16 = vpop.f32.mrf.mxu2 }
 0x28c   : > { %v1188_v1 = vpop.f32.mrf.mxu3  ;;  %1281 = vmatpush.msra.mxu2 %v1162_v16  ;;  %v776_v16 = vld [vmem:[#allocation7 + $0x18] sm:$0xff] }
 0x28e   : > { %1282 = vmatpush.msra.mxu2 %v1159_v14 }
 0x28f   : > { %1911 = vmatmul.msk.f32.vlgmr.msra.gmra.mxu2 %vm580_vm5, %v1903_v18 }
 0x290   : > { %1931 = vmatpush.xpose.msk.msrb.mxu2 %vm580_vm5, %v1920_v19 }
 0x291   : > { %v2886_v20 = vpop.f32.mrf.mxu1 }
 0x292   : > { %v2891_v21 = vpop.f32.mrf.mxu0 }
 0x294   : > { %v1191_v22 = vpop.f32.mrf.mxu3  ;;  %1932 = vmatpush.xpose.msk.msrb.mxu2 %vm580_vm5, %v1919_v17 }
 0x295   : > { %1310 = vmatpush.msra.mxu3 %v1191_v22 }
 0x297   : > { %1311 = vmatpush.msra.mxu3 %v1188_v1  ;;  %1912 = vmatmul.msk.f32.gmra.mxu2 %vm580_vm5, %v1904_v23 }
 0x298   : > { %1913 = vmatmul.msk.f32.vlgmr.msra.gmra.mxu3 %vm580_vm5, %v1905_v24  ;;  %v1944_v24 = vld [vmem:[%s3224_s2 + $0xa8] sm:$0xff] }
 0x299   : > { %v2905_v10 = vpop.f32.mrf.mxu1  ;;  %1935 = vmatpush.xpose.msk.msrb.mxu3 %vm580_vm5, %v1922_v25 }
 0x29a   : > { %v2908_v26 = vpop.f32.mrf.mxu0 }
 0x29d   : > { %1936 = vmatpush.xpose.msk.msrb.mxu3 %vm580_vm5, %v1921_v27 }
 0x29f   : > { %1933 = vmatmul.msk.f32.vlgmr.msrb.gmra.mxu2 %vm580_vm5, %v2748_v37 }
 0x2a0   : > { %1914 = vmatmul.msk.f32.gmra.mxu3 %vm580_vm5, %v1906_v28 }
 0x2a1   : > { %v1130_v29 = vpop.f32.mrf.mxu1 }
 0x2a2   : > { %v1101_v30 = vpop.f32.mrf.mxu0 }
 0x2a7   : > { %1934 = vmatmul.msk.f32.gmra.mxu2 %vm580_vm5, %v2766_v40  ;;  %v775_v40 = vld [vmem:[#allocation7 + $0x10] sm:$0xff] }
 0x2a8   : > { %1937 = vmatmul.msk.f32.vlgmr.msrb.gmra.mxu3 %vm580_vm5, %v2762_v39  ;;  %v773_v39 = vld [vmem:[#allocation7] sm:$0xff]  ;;  %v783_v4 = vadd.f32 %v775_v40, %v2778_v43 }
 0x2a9   : > { %v1133_v31 = vpop.f32.mrf.mxu1  ;;  %v781_v5 = vadd.f32 %v773_v39, %v2774_v42  ;;  %v1664_v39 = vstv %s3066_s6 }
 0x2aa   : > { %v1104_v32 = vpop.f32.mrf.mxu0  ;;  %1252 = vmatpush.msra.mxu1 %v1133_v31  ;;  %v1063_v8 = vadd.f32 %v2886_v20, %v783_v4  ;;  %v1942_v31 = vld [vmem:[%s3224_s2 + $0x98] sm:$0xff]  ;;  %v1692_v4 = vstv %s3068_s11 }
 0x2ab   : > { %1223 = vmatpush.msra.mxu0 %v1104_v32  ;;  %v1061_v6 = vadd.f32 %v2891_v21, %v781_v5  ;;  %v1940_v32 = vld [vmem:[%s3224_s2 + $0x88] sm:$0xff] }
 0x2ac   : > { %1253 = vmatpush.msra.mxu1 %v1130_v29  ;;  %v1941_v29 = vld [vmem:[%s3224_s2 + $0x90] sm:$0xff] }
 0x2ad   : > { %1224 = vmatpush.msra.mxu0 %v1101_v30  ;;  %1909 = vmatmul.msk.f32.vlgmr.msra.gmra.mxu1 %vm580_vm5, %v1901_v33  ;;  %v1939_v30 = vld [vmem:[%s3224_s2 + $0x80] sm:$0xff] }
 0x2ae   : > { %1907 = vmatmul.msk.f32.vlgmr.msra.gmra.mxu0 %vm580_vm5, %v1899_v34  ;;  %1927 = vmatpush.xpose.msk.msrb.mxu1 %vm580_vm5, %v1918_v51  ;;  %v1596_v34 = vstv %s3030_s10  ;;  %v1624_v51 = vstv %s3032_s13 }
 0x2af   : > { %1923 = vmatpush.xpose.msk.msrb.mxu0 %vm580_vm5, %v1916_v63  ;;  %v1652_v63 = vstv %s3034_s17 }
 0x2b0   : > { %1938 = vmatmul.msk.f32.gmra.mxu3 %vm580_vm5, %v2770_v41 }
 0x2b2   : > { %1928 = vmatpush.xpose.msk.msrb.mxu1 %vm580_vm5, %v1917_v35  ;;  %v1680_v35 = vstv %s3036_s21  ;;  %s2183_s21 = scalar_lea.hbm %s3199_s7, 128 }
 0x2b3   : > { %1924 = vmatpush.xpose.msk.msrb.mxu0 %vm580_vm5, %v1915_v36 }
 0x2b5   : > { %1910 = vmatmul.msk.f32.gmra.mxu1 %vm580_vm5, %v1902_v38 }
 0x2b6   : > { %1908 = vmatmul.msk.f32.gmra.mxu0 %vm580_vm5, %v1900_v9  ;;  %v1602_v9 = vstv %s3038_s22 }
 0x2bd   : > { %1929 = vmatmul.msk.f32.vlgmr.msrb.gmra.mxu1 %vm580_vm5, %v2778_v43  ;;  %v774_v43 = vld [vmem:[#allocation7 + $0x8] sm:$0xff] }
 0x2be   : > { %1925 = vmatmul.msk.f32.vlgmr.msrb.gmra.mxu0 %vm580_vm5, %v2774_v42  ;;  %v784_v42 = vadd.f32 %v776_v16, %v2782_v44  ;;  %v782_v18 = vadd.f32 %v774_v43, %v2784_v45 }
 0x2c0   : > { %v1064_v19 = vadd.f32 %v2905_v10, %v784_v42  ;;  %v1062_v20 = vadd.f32 %v2908_v26, %v782_v18  ;;  %v1946_v26 = vld [vmem:[%s3224_s2 + $0xb8] sm:$0xff] }
 0x2c5   : > { %1930 = vmatmul.msk.f32.gmra.mxu1 %vm580_vm5, %v2782_v44  ;;  %v1945_v44 = vld [vmem:[%s3224_s2 + $0xb0] sm:$0xff]  ;;  %s3060_s2 = sld [smem:[#allocation9 + $0x181]] }
 0x2c6   : > { %1926 = vmatmul.msk.f32.gmra.mxu0 %vm580_vm5, %v2784_v45 }
 0x312   : > { %v1284_v49 = vpop.f32.mrf.mxu2 }
 0x313   : > { %v2968_v50 = vadd.f32 %v1284_v49, %v1065_v48  ;;  %v1686_v49 = vstv %s3044_s29 }
 0x31a   : > { %v1287_v58 = vpop.f32.mrf.mxu2 }
 0x31b   : > { %v2974_v13 = vadd.f32 %v1287_v58, %v1066_v56  ;;  %v1313_v59 = vpop.f32.mrf.mxu3  ;;  %v1618_v58 = vstv %s3056_s0  ;;  %s3225_s0 = sshll.u32 %s2399_s16, 6 }
 0x31c   : > { %v2976_v37 = vadd.f32 %v1313_v59, %v1067_v57  ;;  %v1590_v57 = vstv %s3054_s4  ;;  %v1646_v59 = vstv %s3058_s1  ;;  %s3128_s1 = scalar_lea.vmem [#allocation11], %s3225_s0 }
 0x31d   : > { %s1718_s13 = sshll.u32 %s3128_s1, 4  ;;  %s1719_s13 = int_to_ptr.vmem [resolvable:$true] %s1718_s13 }
 0x322   : > { %v1417_v0 = vpop.f32.mrf.mxu2 }
 0x323   : > { %v1316_v2 = vpop.f32.mrf.mxu3 }
 0x324   : > { %v2980_v3 = vadd.f32 %v1316_v2, %v1068_v62  ;;  %v1636_v62 = vstv %s3064_s5 }
 0x32a   : > { %v1255_v7 = vpop.f32.mrf.mxu1  ;;  %v1420_v11 = vpop.f32.mrf.mxu2 }
 0x32b   : > { %v1226_v12 = vpop.f32.mrf.mxu0  ;;  %v2986_v41 = vadd.f32 %v1255_v7, %v1063_v8  ;;  %v1446_v14 = vpop.f32.mrf.mxu3  ;;  %1539 = vmatpush.msra.mxu2 %v1420_v11 }
 0x32c   : > { %v2991_v1 = vadd.f32 %v1226_v12, %v1061_v6 }
 0x32d   : > { %1540 = vmatpush.msra.mxu2 %v1417_v0  ;;  %v1674_v0 = vstv %s3060_s2  ;;  %s1979_s2 = sshll.u32 %s2315_s28, 6 }
 0x32e   : > { %1951 = vmatmul.msk.f32.vlgmr.msra.gmra.mxu2 %vm580_vm5, %v1943_v15  ;;  %s1717_s10 = scalar_lea.hbm %s3199_s7, %s1979_s2 }
 0x32f   : > { %s1720_s17 = sshll.u32 %s1717_s10, 4  ;;  %s1721_s17 = int_to_ptr.hbm [resolvable:$true] %s1720_s17 }
 0x330   : > { %s2177_s5 = sshra.s32 %s1721_s17, 4  ;;  %s2178_s5 = int_to_ptr.hbm [resolvable:$true] %s2177_s5 }
 0x331   : > { %s2179_s6 = scalar_lea.hbm %s2178_s5, 64  ;;  %p2184_p11 = scmp.lt.s32.totalorder %s2178_s5, %s3199_s7 }
 0x332   : > { %v1258_v17 = vpop.f32.mrf.mxu1  ;;  %p2180_p1 = scmp.ne.s32.totalorder %s2178_s5, %s2179_s6  ;;  %p2185_p9 = scmp.lt.s32.totalorder %s2183_s21, %s2179_s6 }
 0x333   : > { %v1229_v21 = vpop.f32.mrf.mxu0  ;;  %v2998_v22 = vadd.f32 %v1258_v17, %v1064_v19  ;;  %v1449_v23 = vpop.f32.mrf.mxu3 }
 0x334   : > { %v3003_v25 = vadd.f32 %v1229_v21, %v1062_v20  ;;  %1568 = vmatpush.msra.mxu3 %v1449_v23  ;;  %p2181_p4 = pnand %p2180_p1, %p2369_p3  ;;  %p2186_p2 = por %p2185_p9, %p2184_p11 }
 0x336   : > { %1569 = vmatpush.msra.mxu3 %v1446_v14  ;;  %1952 = vmatmul.msk.f32.gmra.mxu2 %vm580_vm5, %v1944_v24  ;;  %p2182_p8 = pneg %p2181_p4 }
 0x337   : > { %1953 = vmatmul.msk.f32.vlgmr.msra.gmra.mxu3 %vm580_vm5, %v1945_v44 }
 0x338   : > { %p2187_p10 = pnand %p2186_p2, %p2182_p8 }
 0x33a   : > { %v1388_v45 = vpop.f32.mrf.mxu1 }
 0x33b   : > { %v1359_v10 = vpop.f32.mrf.mxu0 }
 0x33f   : > { %1954 = vmatmul.msk.f32.gmra.mxu3 %vm580_vm5, %v1946_v26 }
 0x342   : > { %v1391_v27 = vpop.f32.mrf.mxu1 }
 0x343   : > { %v1362_v28 = vpop.f32.mrf.mxu0  ;;  %1510 = vmatpush.msra.mxu1 %v1391_v27 }
 0x344   : > { %1481 = vmatpush.msra.mxu0 %v1362_v28 }
 0x345   : > { %1511 = vmatpush.msra.mxu1 %v1388_v45 }
 0x346   : > { %1482 = vmatpush.msra.mxu0 %v1359_v10  ;;  %1949 = vmatmul.msk.f32.vlgmr.msra.gmra.mxu1 %vm580_vm5, %v1941_v29 }
 0x347   : > { %1947 = vmatmul.msk.f32.vlgmr.msra.gmra.mxu0 %vm580_vm5, %v1939_v30 }
 0x34e   : > { %1950 = vmatmul.msk.f32.gmra.mxu1 %vm580_vm5, %v1942_v31 }
 0x34f   : > { %1948 = vmatmul.msk.f32.gmra.mxu0 %vm580_vm5, %v1940_v32 }
 0x3b1   : > { %v1542_v33 = vpop.f32.mrf.mxu2 }
 0x3b2   : > { %v1581_v38 = vadd.f32 %v1542_v33, %v2968_v50 }
 0x3b4   : > { %v1597_v2 = vmul.f32 %v1596_v34, %v1581_v38  ;;  %v1625_v11 = vmul.f32 %v1624_v51, %v1581_v38  ;;  %v1653_v12 = vmul.f32 %v1652_v63, %v1581_v38  ;;  %v1681_v42 = vmul.f32 %v1680_v35, %v1581_v38 }
 0x3b9   : > { %v1545_v48 = vpop.f32.mrf.mxu2 }
 0x3ba   : > { %v1571_v36 = vpop.f32.mrf.mxu3  ;;  %v1582_v40 = vadd.f32 %v1545_v48, %v2974_v13 }
 0x3bb   : > { %v1583_v14 = vadd.f32 %v1571_v36, %v2976_v37 }
 0x3bc   : > { %v1598_v18 = vmul.f32 %v1596_v34, %v1582_v40  ;;  %v1626_v19 = vmul.f32 %v1624_v51, %v1582_v40  ;;  %v1682_v32 = vmul.f32 %v1680_v35, %v1582_v40 }
 0x3bd   : > { %v1603_v44 = vmul.f32 %v1602_v9, %v1583_v14  ;;  %v1631_v37 = vmul.f32 %v1630_v46, %v1583_v14  ;;  %v1659_v45 = vmul.f32 %v1658_v47, %v1583_v14  ;;  %v1687_v10 = vmul.f32 %v1686_v49, %v1583_v14 }
 0x3c2   : > { %v1574_v20 = vpop.f32.mrf.mxu3 }
 0x3c3   : > { %v1513_v56 = vpop.f32.mrf.mxu1  ;;  %v1584_v33 = vadd.f32 %v1574_v20, %v2980_v3 }
 0x3c4   : > { %v1484_v60 = vpop.f32.mrf.mxu0  ;;  %v1579_v50 = vadd.f32 %v1513_v56, %v2986_v41 }
 0x3c5   : > { %v1577_v5 = vadd.f32 %v1484_v60, %v2991_v1  ;;  %v1654_v1 = vmul.f32 %v1652_v63, %v1582_v40 }
 0x3c6   : > { %v1591_v8 = vmul.f32 %v1590_v57, %v1579_v50  ;;  %v1619_v6 = vmul.f32 %v1618_v58, %v1579_v50  ;;  %v1647_v7 = vmul.f32 %v1646_v59, %v1579_v50  ;;  %v1675_v41 = vmul.f32 %v1674_v0, %v1579_v50 }
 0x3c7   : > { %v1587_v15 = vmul.f32 %v1586_v52, %v1577_v5  ;;  %v1615_v16 = vmul.f32 %v1614_v53, %v1577_v5  ;;  %v1643_v43 = vmul.f32 %v1642_v54, %v1577_v5  ;;  %v1671_v13 = vmul.f32 %v1670_v55, %v1577_v5 }
 0x3c9   : > { %v1593_v17 = vadd.f32 %v1591_v8, %v1587_v15  ;;  %v1621_v21 = vadd.f32 %v1619_v6, %v1615_v16  ;;  %v1649_v23 = vadd.f32 %v1647_v7, %v1643_v43  ;;  %v1677_v24 = vadd.f32 %v1675_v41, %v1671_v13  ;;  %v2067_v7 = vld [vmem:[%s2405_s20 + $0x20] sm:$0xff] }
 0x3ca   : > { %v1688_v43 = vmul.f32 %v1686_v49, %v1584_v33 }
 0x3cb   : > { %v1516_v26 = vpop.f32.mrf.mxu1  ;;  %v1599_v27 = vadd.f32 %v1597_v2, %v1593_v17  ;;  %v1627_v28 = vadd.f32 %v1625_v11, %v1621_v21  ;;  %v1655_v29 = vadd.f32 %v1653_v12, %v1649_v23  ;;  %v1683_v30 = vadd.f32 %v1681_v42, %v1677_v24  ;;  %v2068_v12 = vld [vmem:[%s2405_s20 + $0x30] sm:$0xff]  ;;  %v2069_v23 = vld [vmem:[%s2405_s20 + $0x8] sm:$0xff] }
 0x3cc   : > { %v1487_v31 = vpop.f32.mrf.mxu0  ;;  %v1580_v51 = vadd.f32 %v1516_v26, %v2998_v22 }
 0x3cd   : > { %v1578_v34 = vadd.f32 %v1487_v31, %v3003_v25  ;;  %v1605_v63 = vadd.f32 %v1603_v44, %v1599_v27  ;;  %v1633_v36 = vadd.f32 %v1631_v37, %v1627_v28  ;;  %v1661_v38 = vadd.f32 %v1659_v45, %v1655_v29  ;;  %v2070_v44 = vld [vmem:[%s2405_s20 + $0x18] sm:$0xff]  ;;  %v2071_v45 = vld [vmem:[%s2405_s20 + $0x28] sm:$0xff] }
 0x3ce   : > { %v1689_v48 = vadd.f32 %v1687_v10, %v1683_v30  ;;  %v1592_v40 = vmul.f32 %v1590_v57, %v1580_v51  ;;  %v1620_v5 = vmul.f32 %v1618_v58, %v1580_v51  ;;  %v1648_v8 = vmul.f32 %v1646_v59, %v1580_v51 }
 0x3cf   : > { %v1588_v56 = vmul.f32 %v1586_v52, %v1578_v34  ;;  %v1616_v60 = vmul.f32 %v1614_v53, %v1578_v34  ;;  %v1644_v50 = vmul.f32 %v1642_v54, %v1578_v34  ;;  %v1672_v2 = vmul.f32 %v1670_v55, %v1578_v34  ;;  %v2065_v53 = vld [vmem:[%s2405_s20] sm:$0xff]  ;;  %v2066_v55 = vld [vmem:[%s2405_s20 + $0x10] sm:$0xff] }
 0x3d0   : > { %v1609_v35 = vadd.f32 %v1608_v61, %v1605_v63  ;;  %v1637_v3 = vadd.f32 %v1636_v62, %v1633_v36  ;;  %v1665_v25 = vadd.f32 %v1664_v39, %v1661_v38  ;;  %v1693_v22 = vadd.f32 %v1692_v4, %v1689_v48 }
 0x3d1   : > { %v1676_v52 = vmul.f32 %v1674_v0, %v1580_v51  ;;  %v1594_v41 = vadd.f32 %v1592_v40, %v1588_v56  ;;  %v1622_v15 = vadd.f32 %v1620_v5, %v1616_v60  ;;  %v1650_v57 = vadd.f32 %v1648_v8, %v1644_v50 }
 0x3d2   : > { %v1611_v54 = vmul.f32 %v2065_v53, %v1609_v35  ;;  %v1639_v6 = vmul.f32 %v2066_v55, %v1637_v3  ;;  %v1667_v11 = vmul.f32 %v2067_v7, %v1665_v25  ;;  %v1695_v14 = vmul.f32 %v2068_v12, %v1693_v22 }
 0x3d3   : > { %v1678_v16 = vadd.f32 %v1676_v52, %v1672_v2  ;;  %v1604_v58 = vmul.f32 %v1602_v9, %v1584_v33  ;;  %v1632_v59 = vmul.f32 %v1630_v46, %v1584_v33  ;;  %v1660_v0 = vmul.f32 %v1658_v47, %v1584_v33 }
 0x3d4   : > { %1697 = vst.msk [vmem:[%s3128_s1] sm:$0xff] %vm580_vm5, %v1611_v54  ;;  %v1600_v9 = vadd.f32 %v1598_v18, %v1594_v41  ;;  %v1628_v46 = vadd.f32 %v1626_v19, %v1622_v15  ;;  %v1656_v47 = vadd.f32 %v1654_v1, %v1650_v57 }
 0x3d5   : > { %1699 = vst.msk [vmem:[%s3128_s1 + $0x10] sm:$0xff] %vm580_vm5, %v1639_v6  ;;  %v1684_v49 = vadd.f32 %v1682_v32, %v1678_v16 }
 0x3d6   : > { %1701 = vst.msk [vmem:[%s3128_s1 + $0x20] sm:$0xff] %vm580_vm5, %v1667_v11  ;;  %v1606_v13 = vadd.f32 %v1604_v58, %v1600_v9  ;;  %v1634_v42 = vadd.f32 %v1632_v59, %v1628_v46  ;;  %v1662_v20 = vadd.f32 %v1660_v0, %v1656_v47 }
 0x3d7   : > { %1703 = vst.msk [vmem:[%s3128_s1 + $0x30] sm:$0xff] %vm580_vm5, %v1695_v14  ;;  %v1690_v17 = vadd.f32 %v1688_v43, %v1684_v49 }
 0x3d8   : > { %v1610_v18 = vadd.f32 %v1608_v61, %v1606_v13  ;;  %v1638_v19 = vadd.f32 %v1636_v62, %v1634_v42  ;;  %v1666_v1 = vadd.f32 %v1664_v39, %v1662_v20  ;;  %v2072_v61 = vld [vmem:[%s2405_s20 + $0x38] sm:$0xff] }
 0x3d9   : > { %v1694_v21 = vadd.f32 %v1692_v4, %v1690_v17 }
 0x3da   : > { %v1612_v24 = vmul.f32 %v2069_v23, %v1610_v18  ;;  %v1640_v37 = vmul.f32 %v2070_v44, %v1638_v19  ;;  %v1668_v10 = vmul.f32 %v2071_v45, %v1666_v1 }
 0x3db   : > { %v1696_v26 = vmul.f32 %v2072_v61, %v1694_v21 }
 0x3dc   : > { %1698 = vst.msk [vmem:[%s3128_s1 + $0x8] sm:$0xff] %vm580_vm5, %v1612_v24 }
 0x3dd   : > { %1700 = vst.msk [vmem:[%s3128_s1 + $0x18] sm:$0xff] %vm580_vm5, %v1640_v37 }
 0x3de   : > { %1702 = vst.msk [vmem:[%s3128_s1 + $0x28] sm:$0xff] %vm580_vm5, %v1668_v10 }
 0x3df   : > { %1704 = vst.msk [vmem:[%s3128_s1 + $0x38] sm:$0xff] %vm580_vm5, %v1696_v26 }
 0x3e0   : > { %2190 = shalt.err (!%p2187_p10)
}
 0x3e1   : > { %s2252_s16 = smov 128   ;;  %s2253_s30 = smov 8  }
 0x3e2   : > { %1994 = dma.vmem_to_hbm [thread:$0]  (%p2369_p3), %s1719_s13, 1024, %s1721_s17, %s1706_s3, %s2252_s16, %s2252_s16, %s2253_s30  }
 0x3e3 PF: > { %s1735_s29 = sand.u32 1, %s2229_s24   ;;  %p3226_p12 = scmp.ge.s32.totalorder %s2241_s27, 2 }
 0x3e4   : > { %s1736_s12 = scalar_lea.sflag [#allocation4], %s1735_s29 }
 0x3e5   : > { %p2011_p13 = pnand %p3226_p12, %p2329_p6 }
 0x3e7   : > { %p2012_p0 = pneg %p2011_p13 }
 0x3e9   : > { %2224 = dma.done.wait (%p2012_p0), %s1736_s12, 1024  }
 0x3ea   : > { %2226 = vsyncadd (%p2012_p0), %s1736_s12, 4294966272  ;;  %s3227_s19 = sld [smem:[#allocation17_spill]]  ;;  %p23_p5 = scmp.ge.s32.totalorder %s2356_s9, 4  }
 0x3eb   : > { %s3228_s24 = smov %s2233_s25  ;;  %s3229_s25 = smov %s2237_s26 }
 0x3ec   : > { %s3231_s27 = smov %s2356_s9  ;;  %25 = sbr.rel (!%p23_p5) target bundleno = 16 (0x10), region = 111 }
 0x3f0   : > { %s3230_s26 = smov %s3227_s19 }
 0x3f1   :  { %1742 = vsyncpa [#allocation3], 1 }
 0x3f2   :  { %1744 = vsyncpa [#allocation3 + $0x1], 1 }
 0x3f3   :  { %1745 = vsyncpa [#allocation8], 1 }
 0x3f4   :  { %1746 = vsyncpa [#allocation4], 1 }
 0x3f5   :  { %1748 = vsyncpa [#allocation4 + $0x1], 1 }
 0x3f6   :  { %1749 = vsyncpa [#allocation5], 1 }
 0x3f7   :  { %1751 = vsyncpa [#allocation5 + $0x1], 1 }
 0x3f8   :  { %1752 = vsyncpa [#allocation6], 1 }
 0x3f9   :  { %1754 = vsyncpa [#allocation6 + $0x1], 1 }

</bundles_post_ra>
